<compile_context>
chip_gen: v5e
topology: v5e:2x2
jax: 0.10.0
libtpu: 0.0.40
codegen_flags: <defaults>
</compile_context>

<pallas_src>
import functools

import jax
import jax.numpy as jnp
from jax import lax
from jax.experimental import pallas as pl
from jax.experimental.pallas import tpu as pltpu  # noqa: F401  (TPU backend assumed)

# ----- synthetic "config" (small shapes) ------------------------------------
HIDDEN = 32          # config.hidden_size
NUM_HEADS = 2
HEAD_DIM = HIDDEN // NUM_HEADS
INTERMEDIATE = 64    # config.intermediate_size
NUM_LAYERS = 2       # config.num_hidden_layers
VOCAB = 100
MAX_POS = 64
NUM_LABELS = 2       # config.num_labels
SEQ = 8
BATCH = 2
LN_EPS = 1e-5
PAD_ID = 1           # Roberta padding_idx


# ----- shared math helpers ----------------------------------------------------
def _ln(x, g, b):
    mu = jnp.mean(x, axis=-1, keepdims=True)
    var = jnp.mean((x - mu) ** 2, axis=-1, keepdims=True)
    return (x - mu) * lax.rsqrt(var + LN_EPS) * g + b


def _gelu(x):
    # TODO(synk): HF Roberta uses exact (erf-based) gelu; tanh approximation used here.
    c = 0.7978845608028654  # sqrt(2/pi)
    return 0.5 * x * (1.0 + jnp.tanh(c * (x + 0.044715 * x * x * x)))


# ----- the single fused kernel -------------------------------------------------
def _fused_classifier_kernel(ids_ref, pos_ref, bias_ref,
                             wemb_ref, pemb_ref, temb_ref, elng_ref, elnb_ref,
                             wq_ref, bq_ref, wk_ref, bk_ref, wv_ref, bv_ref,
                             wo_ref, bo_ref, ln1g_ref, ln1b_ref,
                             wi_ref, bi_ref, wd_ref, bd_ref, ln2g_ref, ln2b_ref,
                             cw1_ref, cb1_ref, cw2_ref, cb2_ref,
                             out_ref, *, batch, seq):
    bs = batch * seq
    bn = batch * NUM_HEADS

    # ---- embeddings: gather via one-hot matmul (MXU), then LayerNorm ----
    ids = ids_ref[...]                                                     # [bs, 1] i32
    oh_w = (ids == lax.broadcasted_iota(jnp.int32, (bs, VOCAB), 1)).astype(jnp.float32)
    word_e = jnp.dot(oh_w, wemb_ref[...], preferred_element_type=jnp.float32)

    pos = pos_ref[...]                                                     # [bs, 1] i32
    oh_p = (pos == lax.broadcasted_iota(jnp.int32, (bs, MAX_POS), 1)).astype(jnp.float32)
    pos_e = jnp.dot(oh_p, pemb_ref[...], preferred_element_type=jnp.float32)

    x = _ln(word_e + pos_e + temb_ref[...], elng_ref[...], elnb_ref[...])  # [bs, H]

    bias = bias_ref[...]                                                   # [bn, S, S]
    scale = 1.0 / (HEAD_DIM ** 0.5)

    # ---- encoder layers (static loop; all weights already VMEM resident) ----
    for l in range(NUM_LAYERS):
        # (batch*head)-batched attention — heads never sliced / concatenated.
        x3 = x.reshape(batch, seq, HIDDEN)
        xbn = jnp.broadcast_to(x3[:, None], (batch, NUM_HEADS, seq, HIDDEN)
                               ).reshape(bn, seq, HIDDEN)

        q = jnp.einsum('nsh,nhd->nsd', xbn, wq_ref[l],
                       preferred_element_type=jnp.float32) + bq_ref[l]     # [bn,S,HD]
        k = jnp.einsum('nsh,nhd->nsd', xbn, wk_ref[l],
                       preferred_element_type=jnp.float32) + bk_ref[l]
        v = jnp.einsum('nsh,nhd->nsd', xbn, wv_ref[l],
                       preferred_element_type=jnp.float32) + bv_ref[l]

        s = jnp.einsum('nqd,nkd->nqk', q, k,
                       preferred_element_type=jnp.float32) * scale + bias  # [bn,S,S]
        s = s - jnp.max(s, axis=-1, keepdims=True)
        p = jnp.exp(s)
        p = p * pl.reciprocal(jnp.sum(p, axis=-1, keepdims=True), approx=True)

        ctx = jnp.einsum('nqk,nkd->nqd', p, v,
                         preferred_element_type=jnp.float32)               # [bn,S,HD]
        attn = jnp.einsum('nsd,ndh->nsh', ctx, wo_ref[l],
                          preferred_element_type=jnp.float32)              # [bn,S,H]
        attn = attn.reshape(batch, NUM_HEADS, seq, HIDDEN).sum(axis=1)     # merge heads
        attn = attn.reshape(bs, HIDDEN) + bo_ref[l]

        h1 = _ln(attn + x, ln1g_ref[l], ln1b_ref[l])                       # [bs,H]

        inter = _gelu(jnp.dot(h1, wi_ref[l],
                              preferred_element_type=jnp.float32) + bi_ref[l])
        ffn = jnp.dot(inter, wd_ref[l],
                      preferred_element_type=jnp.float32) + bd_ref[l]
        x = _ln(ffn + h1, ln2g_ref[l], ln2b_ref[l])

    # ---- RobertaClassificationHead on the CLS token of every sequence ----
    x_cls = jnp.concatenate([x[b * seq: b * seq + 1, :] for b in range(batch)], axis=0)
    h = jnp.tanh(jnp.dot(x_cls, cw1_ref[...],
                         preferred_element_type=jnp.float32) + cb1_ref[...])
    logits = jnp.dot(h, cw2_ref[...],
                     preferred_element_type=jnp.float32) + cb2_ref[...]
    out_ref[...] = logits.astype(out_ref.dtype)


# ----- weight packing: split per head + stack per layer (host-side, free) ------
def pack_params(params, batch):
    bn = batch * NUM_HEADS
    layers = params['layers']

    def tile_b(a):  # [NH, ...] -> [bn, ...]  (shared weights replicated over batch)
        return jnp.broadcast_to(a[None], (batch,) + a.shape).reshape((bn,) + a.shape[1:])

    def split_qkv_w(w):   # [H, H] -> [bn, H, HD]
        return tile_b(w.reshape(HIDDEN, NUM_HEADS, HEAD_DIM).transpose(1, 0, 2))

    def split_qkv_b(b):   # [1, H] -> [bn, 1, HD]
        return tile_b(b.reshape(NUM_HEADS, 1, HEAD_DIM))

    def split_out_w(w):   # [H, H] -> [bn, HD, H]
        return tile_b(w.reshape(NUM_HEADS, HEAD_DIM, HIDDEN))

    def stack(name, fn=lambda a: a):
        return jnp.stack([fn(lp[name]) for lp in layers], axis=0)

    return dict(
        wq=stack('wq', split_qkv_w), bq=stack('bq', split_qkv_b),
        wk=stack('wk', split_qkv_w), bk=stack('bk', split_qkv_b),
        wv=stack('wv', split_qkv_w), bv=stack('bv', split_qkv_b),
        wo=stack('wo', split_out_w), bo=stack('bo'),
        ln1_g=stack('ln1_g'), ln1_b=stack('ln1_b'),
        wi=stack('wi'), bi=stack('bi'),
        wd=stack('wd'), bd=stack('bd'),
        ln2_g=stack('ln2_g'), ln2_b=stack('ln2_b'),
    )


# ----- deterministic parameter init --------------------------------------------
def init_params(key):
    keys = iter(jax.random.split(key, 64))

    def dense(fan_in, fan_out):
        w = jax.random.normal(next(keys), (fan_in, fan_out), jnp.float32) * 0.02
        b = jnp.zeros((1, fan_out), jnp.float32)
        return w, b

    params = {
        'word_emb': jax.random.normal(next(keys), (VOCAB, HIDDEN), jnp.float32) * 0.02,
        'pos_emb':  jax.random.normal(next(keys), (MAX_POS, HIDDEN), jnp.float32) * 0.02,
        'type_emb': jax.random.normal(next(keys), (1, HIDDEN), jnp.float32) * 0.02,
        'emb_ln_g': jnp.ones((1, HIDDEN), jnp.float32),
        'emb_ln_b': jnp.zeros((1, HIDDEN), jnp.float32),
    }
    layers = []
    for _ in range(NUM_LAYERS):
        wq, bq = dense(HIDDEN, HIDDEN)
        wk, bk = dense(HIDDEN, HIDDEN)
        wv, bv = dense(HIDDEN, HIDDEN)
        wo, bo = dense(HIDDEN, HIDDEN)
        wi, bi = dense(HIDDEN, INTERMEDIATE)
        wd, bd = dense(INTERMEDIATE, HIDDEN)
        layers.append(dict(
            wq=wq, bq=bq, wk=wk, bk=bk, wv=wv, bv=bv, wo=wo, bo=bo,
            ln1_g=jnp.ones((1, HIDDEN), jnp.float32), ln1_b=jnp.zeros((1, HIDDEN), jnp.float32),
            wi=wi, bi=bi, wd=wd, bd=bd,
            ln2_g=jnp.ones((1, HIDDEN), jnp.float32), ln2_b=jnp.zeros((1, HIDDEN), jnp.float32),
        ))
    params['layers'] = layers
    params['cls_dense_w'], params['cls_dense_b'] = dense(HIDDEN, HIDDEN)
    params['cls_out_w'], params['cls_out_b'] = dense(HIDDEN, NUM_LABELS)
    return params


# ----- full forward (Calssifier.forward, use_acc=False path, eval mode) ---------
def classifier_forward(params, input_ids, attention_mask):
    B, S = input_ids.shape
    BS, BN = B * S, B * NUM_HEADS

    # Roberta position ids: created from non-pad tokens (padding_idx = 1).
    not_pad = (input_ids != PAD_ID).astype(jnp.int32)
    pos_ids = jnp.cumsum(not_pad, axis=1) * not_pad + PAD_ID

    ids_col = input_ids.astype(jnp.int32).reshape(BS, 1)
    pos_col = pos_ids.astype(jnp.int32).reshape(BS, 1)

    # Additive attention bias (kept in f32), expanded once to [B*NH, S, S].
    ext = (1.0 - attention_mask.astype(jnp.float32)) * (-1e9)              # [B, S]
    attn_bias = jnp.broadcast_to(ext[:, None, None, :],
                                 (B, NUM_HEADS, S, S)).reshape(BN, S, S)

    pk = pack_params(params, B)

    kernel = functools.partial(_fused_classifier_kernel, batch=B, seq=S)
    # Single fused pallas_call, no grid: every tensor lives whole in VMEM.
    logits = pl.pallas_call(
        kernel,
        out_shape=jax.ShapeDtypeStruct((B, NUM_LABELS), jnp.float32),
    )(ids_col, pos_col, attn_bias,
      params['word_emb'], params['pos_emb'], params['type_emb'],
      params['emb_ln_g'], params['emb_ln_b'],
      pk['wq'], pk['bq'], pk['wk'], pk['bk'], pk['wv'], pk['bv'],
      pk['wo'], pk['bo'], pk['ln1_g'], pk['ln1_b'],
      pk['wi'], pk['bi'], pk['wd'], pk['bd'], pk['ln2_g'], pk['ln2_b'],
      params['cls_dense_w'], params['cls_dense_b'],
      params['cls_out_w'], params['cls_out_b'])
    return logits


# ----- pure-JAX reference (same math, standard ops) for a sanity check ----------
def classifier_forward_ref(params, input_ids, attention_mask):
    B, S = input_ids.shape
    not_pad = (input_ids != PAD_ID).astype(jnp.int32)
    pos_ids = jnp.cumsum(not_pad, axis=1) * not_pad + PAD_ID
    emb = (params['word_emb'][input_ids]
           + params['pos_emb'][pos_ids]
           + params['type_emb'][jnp.zeros_like(input_ids)])
    x = _ln(emb, params['emb_ln_g'], params['emb_ln_b'])                   # [B,S,H]

    bias = (1.0 - attention_mask.astype(jnp.float32))[:, None, None, :] * (-1e9)
    scale = 1.0 / (HEAD_DIM ** 0.5)
    for lp in params['layers']:
        q = x @ lp['wq'] + lp['bq']
        k = x @ lp['wk'] + lp['bk']
        v = x @ lp['wv'] + lp['bv']

        def heads(t):
            return t.reshape(B, S, NUM_HEADS, HEAD_DIM).transpose(0, 2, 1, 3)

        s = jnp.einsum('bhqd,bhkd->bhqk', heads(q), heads(k)) * scale + bias
        p = jax.nn.softmax(s, axis=-1)
        ctx = jnp.einsum('bhqk,bhkd->bhqd', p, heads(v))
        ctx = ctx.transpose(0, 2, 1, 3).reshape(B, S, HIDDEN)
        attn = ctx @ lp['wo'] + lp['bo']
        h1 = _ln(attn + x, lp['ln1_g'], lp['ln1_b'])
        inter = _gelu(h1 @ lp['wi'] + lp['bi'])
        x = _ln(inter @ lp['wd'] + lp['bd'] + h1, lp['ln2_g'], lp['ln2_b'])

    x_cls = x[:, 0, :]
    h = jnp.tanh(x_cls @ params['cls_dense_w'] + params['cls_dense_b'])
    return h @ params['cls_out_w'] + params['cls_out_b']


if __name__ == "__main__":
    key = jax.random.PRNGKey(0)
    pkey, dkey = jax.random.split(key)
    params = init_params(pkey)

    input_ids = jax.random.randint(dkey, (BATCH, SEQ), 2, VOCAB, dtype=jnp.int32)
    attention_mask = jnp.ones((BATCH, SEQ), dtype=jnp.int32)

    logits = jax.jit(classifier_forward)(params, input_ids, attention_mask)
    jax.block_until_ready(logits)

    assert logits.shape == (BATCH, NUM_LABELS)
    assert bool(jnp.all(jnp.isfinite(logits)))

    ref = classifier_forward_ref(params, input_ids, attention_mask)
    assert jnp.allclose(logits, ref, atol=1e-2, rtol=1e-2)

    print("KERNEL_OK")
</pallas_src>

<mosaic_0001>
module attributes {stable_mosaic.version = 11 : i64} {
  func.func @_fused_classifier_kernel(%arg0: memref<16x1xi32, #tpu.memory_space<vmem>>, %arg1: memref<16x1xi32, #tpu.memory_space<vmem>>, %arg2: memref<4x8x8xf32, #tpu.memory_space<vmem>>, %arg3: memref<100x32xf32, #tpu.memory_space<vmem>>, %arg4: memref<64x32xf32, #tpu.memory_space<vmem>>, %arg5: memref<1x32xf32, #tpu.memory_space<vmem>>, %arg6: memref<1x32xf32, #tpu.memory_space<vmem>>, %arg7: memref<1x32xf32, #tpu.memory_space<vmem>>, %arg8: memref<2x4x32x16xf32, #tpu.memory_space<vmem>>, %arg9: memref<2x4x1x16xf32, #tpu.memory_space<vmem>>, %arg10: memref<2x4x32x16xf32, #tpu.memory_space<vmem>>, %arg11: memref<2x4x1x16xf32, #tpu.memory_space<vmem>>, %arg12: memref<2x4x32x16xf32, #tpu.memory_space<vmem>>, %arg13: memref<2x4x1x16xf32, #tpu.memory_space<vmem>>, %arg14: memref<2x4x16x32xf32, #tpu.memory_space<vmem>>, %arg15: memref<2x1x32xf32, #tpu.memory_space<vmem>>, %arg16: memref<2x1x32xf32, #tpu.memory_space<vmem>>, %arg17: memref<2x1x32xf32, #tpu.memory_space<vmem>>, %arg18: memref<2x32x64xf32, #tpu.memory_space<vmem>>, %arg19: memref<2x1x64xf32, #tpu.memory_space<vmem>>, %arg20: memref<2x64x32xf32, #tpu.memory_space<vmem>>, %arg21: memref<2x1x32xf32, #tpu.memory_space<vmem>>, %arg22: memref<2x1x32xf32, #tpu.memory_space<vmem>>, %arg23: memref<2x1x32xf32, #tpu.memory_space<vmem>>, %arg24: memref<32x32xf32, #tpu.memory_space<vmem>>, %arg25: memref<1x32xf32, #tpu.memory_space<vmem>>, %arg26: memref<32x2xf32, #tpu.memory_space<vmem>>, %arg27: memref<1x2xf32, #tpu.memory_space<vmem>>, %arg28: memref<2x2xf32, #tpu.memory_space<vmem>>) attributes {dimension_semantics = [], scalar_prefetch = 0 : i64, scratch_operands = 0 : i64, tpu.core_type = #tpu.core_type<tc>} {
    %c0 = arith.constant 0 : index
    %c0_0 = arith.constant 0 : index
    %0 = vector.load %arg0[%c0, %c0_0] : memref<16x1xi32, #tpu.memory_space<vmem>>, vector<16x1xi32>
    %1 = tpu.iota {dimensions = array<i32: 1>} : vector<16x100xi32>
    %2 = vector.broadcast %0 : vector<16x1xi32> to vector<16x100xi32>
    %3 = arith.cmpi eq, %2, %1 : vector<16x100xi32>
    %4 = arith.extui %3 : vector<16x100xi1> to vector<16x100xi32>
    %5 = arith.sitofp %4 : vector<16x100xi32> to vector<16x100xf32>
    %c0_1 = arith.constant 0 : index
    %c0_2 = arith.constant 0 : index
    %6 = vector.load %arg3[%c0_1, %c0_2] : memref<100x32xf32, #tpu.memory_space<vmem>>, vector<100x32xf32>
    %cst = arith.constant dense<0.000000e+00> : vector<16x32xf32>
    %7 = tpu.matmul %5, %6, %cst {dimension_numbers = #tpu.dot_dimension_numbers<[1], [0], [0], [1], [0, 0, 1, 1], [], []>} : vector<16x100xf32>, vector<100x32xf32>, vector<16x32xf32> -> vector<16x32xf32>
    %c0_3 = arith.constant 0 : index
    %c0_4 = arith.constant 0 : index
    %8 = vector.load %arg1[%c0_3, %c0_4] : memref<16x1xi32, #tpu.memory_space<vmem>>, vector<16x1xi32>
    %9 = tpu.iota {dimensions = array<i32: 1>} : vector<16x64xi32>
    %10 = vector.broadcast %8 : vector<16x1xi32> to vector<16x64xi32>
    %11 = arith.cmpi eq, %10, %9 : vector<16x64xi32>
    %12 = arith.extui %11 : vector<16x64xi1> to vector<16x64xi32>
    %13 = arith.sitofp %12 : vector<16x64xi32> to vector<16x64xf32>
    %c0_5 = arith.constant 0 : index
    %c0_6 = arith.constant 0 : index
    %14 = vector.load %arg4[%c0_5, %c0_6] : memref<64x32xf32, #tpu.memory_space<vmem>>, vector<64x32xf32>
    %cst_7 = arith.constant dense<0.000000e+00> : vector<16x32xf32>
    %15 = tpu.matmul %13, %14, %cst_7 {dimension_numbers = #tpu.dot_dimension_numbers<[1], [0], [0], [1], [0, 0, 1, 1], [], []>} : vector<16x64xf32>, vector<64x32xf32>, vector<16x32xf32> -> vector<16x32xf32>
    %16 = arith.addf %7, %15 : vector<16x32xf32>
    %c0_8 = arith.constant 0 : index
    %c0_9 = arith.constant 0 : index
    %17 = vector.load %arg5[%c0_8, %c0_9] : memref<1x32xf32, #tpu.memory_space<vmem>>, vector<1x32xf32>
    %18 = vector.broadcast %17 : vector<1x32xf32> to vector<16x32xf32>
    %19 = arith.addf %16, %18 : vector<16x32xf32>
    %c0_10 = arith.constant 0 : index
    %c0_11 = arith.constant 0 : index
    %20 = vector.load %arg6[%c0_10, %c0_11] : memref<1x32xf32, #tpu.memory_space<vmem>>, vector<1x32xf32>
    %c0_12 = arith.constant 0 : index
    %c0_13 = arith.constant 0 : index
    %21 = vector.load %arg7[%c0_12, %c0_13] : memref<1x32xf32, #tpu.memory_space<vmem>>, vector<1x32xf32>
    %cst_14 = arith.constant dense<0.000000e+00> : vector<16xf32>
    %22 = vector.multi_reduction <add>, %19, %cst_14 [1] : vector<16x32xf32> to vector<16xf32>
    %23 = vector.shape_cast %22 : vector<16xf32> to vector<16x1xf32>
    %cst_15 = arith.constant 3.200000e+01 : f32
    %24 = vector.broadcast %cst_15 : f32 to vector<16x1xf32>
    %25 = arith.divf %23, %24 : vector<16x1xf32>
    %26 = vector.broadcast %25 : vector<16x1xf32> to vector<16x32xf32>
    %27 = arith.subf %19, %26 : vector<16x32xf32>
    %28 = arith.mulf %27, %27 : vector<16x32xf32>
    %cst_16 = arith.constant dense<0.000000e+00> : vector<16xf32>
    %29 = vector.multi_reduction <add>, %28, %cst_16 [1] : vector<16x32xf32> to vector<16xf32>
    %30 = vector.shape_cast %29 : vector<16xf32> to vector<16x1xf32>
    %cst_17 = arith.constant 3.200000e+01 : f32
    %31 = vector.broadcast %cst_17 : f32 to vector<16x1xf32>
    %32 = arith.divf %30, %31 : vector<16x1xf32>
    %33 = vector.broadcast %25 : vector<16x1xf32> to vector<16x32xf32>
    %34 = arith.subf %19, %33 : vector<16x32xf32>
    %cst_18 = arith.constant 9.99999974E-6 : f32
    %35 = vector.broadcast %cst_18 : f32 to vector<16x1xf32>
    %36 = arith.addf %32, %35 : vector<16x1xf32>
    %37 = math.rsqrt %36 : vector<16x1xf32>
    %38 = vector.broadcast %37 : vector<16x1xf32> to vector<16x32xf32>
    %39 = arith.mulf %34, %38 : vector<16x32xf32>
    %40 = vector.broadcast %20 : vector<1x32xf32> to vector<16x32xf32>
    %41 = arith.mulf %39, %40 : vector<16x32xf32>
    %42 = vector.broadcast %21 : vector<1x32xf32> to vector<16x32xf32>
    %43 = arith.addf %41, %42 : vector<16x32xf32>
    %c0_19 = arith.constant 0 : index
    %c0_20 = arith.constant 0 : index
    %c0_21 = arith.constant 0 : index
    %44 = vector.load %arg2[%c0_19, %c0_20, %c0_21] : memref<4x8x8xf32, #tpu.memory_space<vmem>>, vector<4x8x8xf32>
    %45 = vector.shape_cast %43 : vector<16x32xf32> to vector<2x8x32xf32>
    %46 = vector.shape_cast %45 : vector<2x8x32xf32> to vector<2x1x8x32xf32>
    %47 = vector.shape_cast %46 : vector<2x1x8x32xf32> to vector<2x1x8x32xf32>
    %48 = vector.broadcast %47 : vector<2x1x8x32xf32> to vector<2x2x8x32xf32>
    %49 = vector.shape_cast %48 : vector<2x2x8x32xf32> to vector<4x8x32xf32>
    %c0_22 = arith.constant 0 : index
    %c0_23 = arith.constant 0 : index
    %c0_24 = arith.constant 0 : index
    %c0_25 = arith.constant 0 : index
    %50 = vector.load %arg8[%c0_22, %c0_23, %c0_24, %c0_25] : memref<2x4x32x16xf32, #tpu.memory_space<vmem>>, vector<1x4x32x16xf32>
    %51 = vector.shape_cast %50 : vector<1x4x32x16xf32> to vector<4x32x16xf32>
    "tpu.trace_start"() <{level = 10 : i32, message = "nsh,nhd->nsd"}> : () -> ()
    %cst_26 = arith.constant dense<0.000000e+00> : vector<4x8x16xf32>
    %52 = tpu.matmul %49, %51, %cst_26 {dimension_numbers = #tpu.dot_dimension_numbers<[2], [1], [1], [2], [0, 0, 0, 1, 1, 2], [0], [0]>} : vector<4x8x32xf32>, vector<4x32x16xf32>, vector<4x8x16xf32> -> vector<4x8x16xf32>
    "tpu.trace_stop"() : () -> ()
    %c0_27 = arith.constant 0 : index
    %c0_28 = arith.constant 0 : index
    %c0_29 = arith.constant 0 : index
    %c0_30 = arith.constant 0 : index
    %53 = vector.load %arg9[%c0_27, %c0_28, %c0_29, %c0_30] : memref<2x4x1x16xf32, #tpu.memory_space<vmem>>, vector<1x4x1x16xf32>
    %54 = vector.shape_cast %53 : vector<1x4x1x16xf32> to vector<4x1x16xf32>
    %55 = vector.broadcast %54 : vector<4x1x16xf32> to vector<4x8x16xf32>
    %56 = arith.addf %52, %55 : vector<4x8x16xf32>
    %c0_31 = arith.constant 0 : index
    %c0_32 = arith.constant 0 : index
    %c0_33 = arith.constant 0 : index
    %c0_34 = arith.constant 0 : index
    %57 = vector.load %arg10[%c0_31, %c0_32, %c0_33, %c0_34] : memref<2x4x32x16xf32, #tpu.memory_space<vmem>>, vector<1x4x32x16xf32>
    %58 = vector.shape_cast %57 : vector<1x4x32x16xf32> to vector<4x32x16xf32>
    "tpu.trace_start"() <{level = 10 : i32, message = "nsh,nhd->nsd"}> : () -> ()
    %cst_35 = arith.constant dense<0.000000e+00> : vector<4x8x16xf32>
    %59 = tpu.matmul %49, %58, %cst_35 {dimension_numbers = #tpu.dot_dimension_numbers<[2], [1], [1], [2], [0, 0, 0, 1, 1, 2], [0], [0]>} : vector<4x8x32xf32>, vector<4x32x16xf32>, vector<4x8x16xf32> -> vector<4x8x16xf32>
    "tpu.trace_stop"() : () -> ()
    %c0_36 = arith.constant 0 : index
    %c0_37 = arith.constant 0 : index
    %c0_38 = arith.constant 0 : index
    %c0_39 = arith.constant 0 : index
    %60 = vector.load %arg11[%c0_36, %c0_37, %c0_38, %c0_39] : memref<2x4x1x16xf32, #tpu.memory_space<vmem>>, vector<1x4x1x16xf32>
    %61 = vector.shape_cast %60 : vector<1x4x1x16xf32> to vector<4x1x16xf32>
    %62 = vector.broadcast %61 : vector<4x1x16xf32> to vector<4x8x16xf32>
    %63 = arith.addf %59, %62 : vector<4x8x16xf32>
    %c0_40 = arith.constant 0 : index
    %c0_41 = arith.constant 0 : index
    %c0_42 = arith.constant 0 : index
    %c0_43 = arith.constant 0 : index
    %64 = vector.load %arg12[%c0_40, %c0_41, %c0_42, %c0_43] : memref<2x4x32x16xf32, #tpu.memory_space<vmem>>, vector<1x4x32x16xf32>
    %65 = vector.shape_cast %64 : vector<1x4x32x16xf32> to vector<4x32x16xf32>
    "tpu.trace_start"() <{level = 10 : i32, message = "nsh,nhd->nsd"}> : () -> ()
    %cst_44 = arith.constant dense<0.000000e+00> : vector<4x8x16xf32>
    %66 = tpu.matmul %49, %65, %cst_44 {dimension_numbers = #tpu.dot_dimension_numbers<[2], [1], [1], [2], [0, 0, 0, 1, 1, 2], [0], [0]>} : vector<4x8x32xf32>, vector<4x32x16xf32>, vector<4x8x16xf32> -> vector<4x8x16xf32>
    "tpu.trace_stop"() : () -> ()
    %c0_45 = arith.constant 0 : index
    %c0_46 = arith.constant 0 : index
    %c0_47 = arith.constant 0 : index
    %c0_48 = arith.constant 0 : index
    %67 = vector.load %arg13[%c0_45, %c0_46, %c0_47, %c0_48] : memref<2x4x1x16xf32, #tpu.memory_space<vmem>>, vector<1x4x1x16xf32>
    %68 = vector.shape_cast %67 : vector<1x4x1x16xf32> to vector<4x1x16xf32>
    %69 = vector.broadcast %68 : vector<4x1x16xf32> to vector<4x8x16xf32>
    %70 = arith.addf %66, %69 : vector<4x8x16xf32>
    "tpu.trace_start"() <{level = 10 : i32, message = "nqd,nkd->nqk"}> : () -> ()
    %cst_49 = arith.constant dense<0.000000e+00> : vector<4x8x8xf32>
    %71 = tpu.matmul %56, %63, %cst_49 {dimension_numbers = #tpu.dot_dimension_numbers<[2], [2], [1], [1], [0, 0, 0, 1, 1, 1], [0], [0]>} : vector<4x8x16xf32>, vector<4x8x16xf32>, vector<4x8x8xf32> -> vector<4x8x8xf32>
    "tpu.trace_stop"() : () -> ()
    %cst_50 = arith.constant 2.500000e-01 : f32
    %72 = vector.broadcast %cst_50 : f32 to vector<4x8x8xf32>
    %73 = arith.mulf %71, %72 : vector<4x8x8xf32>
    %74 = arith.addf %73, %44 : vector<4x8x8xf32>
    %cst_51 = arith.constant dense<0xFF800000> : vector<4x8xf32>
    %75 = vector.multi_reduction <maximumf>, %74, %cst_51 [2] : vector<4x8x8xf32> to vector<4x8xf32>
    %76 = vector.shape_cast %75 : vector<4x8xf32> to vector<4x8x1xf32>
    %77 = vector.broadcast %76 : vector<4x8x1xf32> to vector<4x8x8xf32>
    %78 = arith.subf %74, %77 : vector<4x8x8xf32>
    %79 = math.exp %78 : vector<4x8x8xf32>
    %cst_52 = arith.constant dense<0.000000e+00> : vector<4x8xf32>
    %80 = vector.multi_reduction <add>, %79, %cst_52 [2] : vector<4x8x8xf32> to vector<4x8xf32>
    %81 = vector.shape_cast %80 : vector<4x8xf32> to vector<4x8x1xf32>
    %82 = tpu.reciprocal %81 {approx = true} : vector<4x8x1xf32> -> vector<4x8x1xf32>
    %83 = vector.broadcast %82 : vector<4x8x1xf32> to vector<4x8x8xf32>
    %84 = arith.mulf %79, %83 : vector<4x8x8xf32>
    "tpu.trace_start"() <{level = 10 : i32, message = "nqk,nkd->nqd"}> : () -> ()
    %cst_53 = arith.constant dense<0.000000e+00> : vector<4x8x16xf32>
    %85 = tpu.matmul %84, %70, %cst_53 {dimension_numbers = #tpu.dot_dimension_numbers<[2], [1], [1], [2], [0, 0, 0, 1, 1, 2], [0], [0]>} : vector<4x8x8xf32>, vector<4x8x16xf32>, vector<4x8x16xf32> -> vector<4x8x16xf32>
    "tpu.trace_stop"() : () -> ()
    %c0_54 = arith.constant 0 : index
    %c0_55 = arith.constant 0 : index
    %c0_56 = arith.constant 0 : index
    %c0_57 = arith.constant 0 : index
    %86 = vector.load %arg14[%c0_54, %c0_55, %c0_56, %c0_57] : memref<2x4x16x32xf32, #tpu.memory_space<vmem>>, vector<1x4x16x32xf32>
    %87 = vector.shape_cast %86 : vector<1x4x16x32xf32> to vector<4x16x32xf32>
    "tpu.trace_start"() <{level = 10 : i32, message = "nsd,ndh->nsh"}> : () -> ()
    %cst_58 = arith.constant dense<0.000000e+00> : vector<4x8x32xf32>
    %88 = tpu.matmul %85, %87, %cst_58 {dimension_numbers = #tpu.dot_dimension_numbers<[2], [1], [1], [2], [0, 0, 0, 1, 1, 2], [0], [0]>} : vector<4x8x16xf32>, vector<4x16x32xf32>, vector<4x8x32xf32> -> vector<4x8x32xf32>
    "tpu.trace_stop"() : () -> ()
    %89 = vector.shape_cast %88 : vector<4x8x32xf32> to vector<2x2x8x32xf32>
    %cst_59 = arith.constant dense<0.000000e+00> : vector<2x8x32xf32>
    %90 = vector.multi_reduction <add>, %89, %cst_59 [1] : vector<2x2x8x32xf32> to vector<2x8x32xf32>
    %91 = vector.shape_cast %90 : vector<2x8x32xf32> to vector<16x32xf32>
    %c0_60 = arith.constant 0 : index
    %c0_61 = arith.constant 0 : index
    %c0_62 = arith.constant 0 : index
    %92 = vector.load %arg15[%c0_60, %c0_61, %c0_62] : memref<2x1x32xf32, #tpu.memory_space<vmem>>, vector<1x1x32xf32>
    %93 = vector.shape_cast %92 : vector<1x1x32xf32> to vector<1x32xf32>
    %94 = vector.broadcast %93 : vector<1x32xf32> to vector<16x32xf32>
    %95 = arith.addf %91, %94 : vector<16x32xf32>
    %96 = arith.addf %95, %43 : vector<16x32xf32>
    %c0_63 = arith.constant 0 : index
    %c0_64 = arith.constant 0 : index
    %c0_65 = arith.constant 0 : index
    %97 = vector.load %arg16[%c0_63, %c0_64, %c0_65] : memref<2x1x32xf32, #tpu.memory_space<vmem>>, vector<1x1x32xf32>
    %98 = vector.shape_cast %97 : vector<1x1x32xf32> to vector<1x32xf32>
    %c0_66 = arith.constant 0 : index
    %c0_67 = arith.constant 0 : index
    %c0_68 = arith.constant 0 : index
    %99 = vector.load %arg17[%c0_66, %c0_67, %c0_68] : memref<2x1x32xf32, #tpu.memory_space<vmem>>, vector<1x1x32xf32>
    %100 = vector.shape_cast %99 : vector<1x1x32xf32> to vector<1x32xf32>
    %cst_69 = arith.constant dense<0.000000e+00> : vector<16xf32>
    %101 = vector.multi_reduction <add>, %96, %cst_69 [1] : vector<16x32xf32> to vector<16xf32>
    %102 = vector.shape_cast %101 : vector<16xf32> to vector<16x1xf32>
    %cst_70 = arith.constant 3.200000e+01 : f32
    %103 = vector.broadcast %cst_70 : f32 to vector<16x1xf32>
    %104 = arith.divf %102, %103 : vector<16x1xf32>
    %105 = vector.broadcast %104 : vector<16x1xf32> to vector<16x32xf32>
    %106 = arith.subf %96, %105 : vector<16x32xf32>
    %107 = arith.mulf %106, %106 : vector<16x32xf32>
    %cst_71 = arith.constant dense<0.000000e+00> : vector<16xf32>
    %108 = vector.multi_reduction <add>, %107, %cst_71 [1] : vector<16x32xf32> to vector<16xf32>
    %109 = vector.shape_cast %108 : vector<16xf32> to vector<16x1xf32>
    %cst_72 = arith.constant 3.200000e+01 : f32
    %110 = vector.broadcast %cst_72 : f32 to vector<16x1xf32>
    %111 = arith.divf %109, %110 : vector<16x1xf32>
    %112 = vector.broadcast %104 : vector<16x1xf32> to vector<16x32xf32>
    %113 = arith.subf %96, %112 : vector<16x32xf32>
    %cst_73 = arith.constant 9.99999974E-6 : f32
    %114 = vector.broadcast %cst_73 : f32 to vector<16x1xf32>
    %115 = arith.addf %111, %114 : vector<16x1xf32>
    %116 = math.rsqrt %115 : vector<16x1xf32>
    %117 = vector.broadcast %116 : vector<16x1xf32> to vector<16x32xf32>
    %118 = arith.mulf %113, %117 : vector<16x32xf32>
    %119 = vector.broadcast %98 : vector<1x32xf32> to vector<16x32xf32>
    %120 = arith.mulf %118, %119 : vector<16x32xf32>
    %121 = vector.broadcast %100 : vector<1x32xf32> to vector<16x32xf32>
    %122 = arith.addf %120, %121 : vector<16x32xf32>
    %c0_74 = arith.constant 0 : index
    %c0_75 = arith.constant 0 : index
    %c0_76 = arith.constant 0 : index
    %123 = vector.load %arg18[%c0_74, %c0_75, %c0_76] : memref<2x32x64xf32, #tpu.memory_space<vmem>>, vector<1x32x64xf32>
    %124 = vector.shape_cast %123 : vector<1x32x64xf32> to vector<32x64xf32>
    %cst_77 = arith.constant dense<0.000000e+00> : vector<16x64xf32>
    %125 = tpu.matmul %122, %124, %cst_77 {dimension_numbers = #tpu.dot_dimension_numbers<[1], [0], [0], [1], [0, 0, 1, 1], [], []>} : vector<16x32xf32>, vector<32x64xf32>, vector<16x64xf32> -> vector<16x64xf32>
    %c0_78 = arith.constant 0 : index
    %c0_79 = arith.constant 0 : index
    %c0_80 = arith.constant 0 : index
    %126 = vector.load %arg19[%c0_78, %c0_79, %c0_80] : memref<2x1x64xf32, #tpu.memory_space<vmem>>, vector<1x1x64xf32>
    %127 = vector.shape_cast %126 : vector<1x1x64xf32> to vector<1x64xf32>
    %128 = vector.broadcast %127 : vector<1x64xf32> to vector<16x64xf32>
    %129 = arith.addf %125, %128 : vector<16x64xf32>
    %cst_81 = arith.constant 5.000000e-01 : f32
    %130 = vector.broadcast %cst_81 : f32 to vector<16x64xf32>
    %131 = arith.mulf %130, %129 : vector<16x64xf32>
    %cst_82 = arith.constant 4.471500e-02 : f32
    %132 = vector.broadcast %cst_82 : f32 to vector<16x64xf32>
    %133 = arith.mulf %132, %129 : vector<16x64xf32>
    %134 = arith.mulf %133, %129 : vector<16x64xf32>
    %135 = arith.mulf %134, %129 : vector<16x64xf32>
    %136 = arith.addf %129, %135 : vector<16x64xf32>
    %cst_83 = arith.constant 0.797884583 : f32
    %137 = vector.broadcast %cst_83 : f32 to vector<16x64xf32>
    %138 = arith.mulf %137, %136 : vector<16x64xf32>
    %139 = math.tanh %138 : vector<16x64xf32>
    %cst_84 = arith.constant 1.000000e+00 : f32
    %140 = vector.broadcast %cst_84 : f32 to vector<16x64xf32>
    %141 = arith.addf %140, %139 : vector<16x64xf32>
    %142 = arith.mulf %131, %141 : vector<16x64xf32>
    %c0_85 = arith.constant 0 : index
    %c0_86 = arith.constant 0 : index
    %c0_87 = arith.constant 0 : index
    %143 = vector.load %arg20[%c0_85, %c0_86, %c0_87] : memref<2x64x32xf32, #tpu.memory_space<vmem>>, vector<1x64x32xf32>
    %144 = vector.shape_cast %143 : vector<1x64x32xf32> to vector<64x32xf32>
    %cst_88 = arith.constant dense<0.000000e+00> : vector<16x32xf32>
    %145 = tpu.matmul %142, %144, %cst_88 {dimension_numbers = #tpu.dot_dimension_numbers<[1], [0], [0], [1], [0, 0, 1, 1], [], []>} : vector<16x64xf32>, vector<64x32xf32>, vector<16x32xf32> -> vector<16x32xf32>
    %c0_89 = arith.constant 0 : index
    %c0_90 = arith.constant 0 : index
    %c0_91 = arith.constant 0 : index
    %146 = vector.load %arg21[%c0_89, %c0_90, %c0_91] : memref<2x1x32xf32, #tpu.memory_space<vmem>>, vector<1x1x32xf32>
    %147 = vector.shape_cast %146 : vector<1x1x32xf32> to vector<1x32xf32>
    %148 = vector.broadcast %147 : vector<1x32xf32> to vector<16x32xf32>
    %149 = arith.addf %145, %148 : vector<16x32xf32>
    %150 = arith.addf %149, %122 : vector<16x32xf32>
    %c0_92 = arith.constant 0 : index
    %c0_93 = arith.constant 0 : index
    %c0_94 = arith.constant 0 : index
    %151 = vector.load %arg22[%c0_92, %c0_93, %c0_94] : memref<2x1x32xf32, #tpu.memory_space<vmem>>, vector<1x1x32xf32>
    %152 = vector.shape_cast %151 : vector<1x1x32xf32> to vector<1x32xf32>
    %c0_95 = arith.constant 0 : index
    %c0_96 = arith.constant 0 : index
    %c0_97 = arith.constant 0 : index
    %153 = vector.load %arg23[%c0_95, %c0_96, %c0_97] : memref<2x1x32xf32, #tpu.memory_space<vmem>>, vector<1x1x32xf32>
    %154 = vector.shape_cast %153 : vector<1x1x32xf32> to vector<1x32xf32>
    %cst_98 = arith.constant dense<0.000000e+00> : vector<16xf32>
    %155 = vector.multi_reduction <add>, %150, %cst_98 [1] : vector<16x32xf32> to vector<16xf32>
    %156 = vector.shape_cast %155 : vector<16xf32> to vector<16x1xf32>
    %cst_99 = arith.constant 3.200000e+01 : f32
    %157 = vector.broadcast %cst_99 : f32 to vector<16x1xf32>
    %158 = arith.divf %156, %157 : vector<16x1xf32>
    %159 = vector.broadcast %158 : vector<16x1xf32> to vector<16x32xf32>
    %160 = arith.subf %150, %159 : vector<16x32xf32>
    %161 = arith.mulf %160, %160 : vector<16x32xf32>
    %cst_100 = arith.constant dense<0.000000e+00> : vector<16xf32>
    %162 = vector.multi_reduction <add>, %161, %cst_100 [1] : vector<16x32xf32> to vector<16xf32>
    %163 = vector.shape_cast %162 : vector<16xf32> to vector<16x1xf32>
    %cst_101 = arith.constant 3.200000e+01 : f32
    %164 = vector.broadcast %cst_101 : f32 to vector<16x1xf32>
    %165 = arith.divf %163, %164 : vector<16x1xf32>
    %166 = vector.broadcast %158 : vector<16x1xf32> to vector<16x32xf32>
    %167 = arith.subf %150, %166 : vector<16x32xf32>
    %cst_102 = arith.constant 9.99999974E-6 : f32
    %168 = vector.broadcast %cst_102 : f32 to vector<16x1xf32>
    %169 = arith.addf %165, %168 : vector<16x1xf32>
    %170 = math.rsqrt %169 : vector<16x1xf32>
    %171 = vector.broadcast %170 : vector<16x1xf32> to vector<16x32xf32>
    %172 = arith.mulf %167, %171 : vector<16x32xf32>
    %173 = vector.broadcast %152 : vector<1x32xf32> to vector<16x32xf32>
    %174 = arith.mulf %172, %173 : vector<16x32xf32>
    %175 = vector.broadcast %154 : vector<1x32xf32> to vector<16x32xf32>
    %176 = arith.addf %174, %175 : vector<16x32xf32>
    %177 = vector.shape_cast %176 : vector<16x32xf32> to vector<2x8x32xf32>
    %178 = vector.shape_cast %177 : vector<2x8x32xf32> to vector<2x1x8x32xf32>
    %179 = vector.shape_cast %178 : vector<2x1x8x32xf32> to vector<2x1x8x32xf32>
    %180 = vector.broadcast %179 : vector<2x1x8x32xf32> to vector<2x2x8x32xf32>
    %181 = vector.shape_cast %180 : vector<2x2x8x32xf32> to vector<4x8x32xf32>
    %c1 = arith.constant 1 : index
    %c0_103 = arith.constant 0 : index
    %c0_104 = arith.constant 0 : index
    %c0_105 = arith.constant 0 : index
    %182 = vector.load %arg8[%c1, %c0_103, %c0_104, %c0_105] : memref<2x4x32x16xf32, #tpu.memory_space<vmem>>, vector<1x4x32x16xf32>
    %183 = vector.shape_cast %182 : vector<1x4x32x16xf32> to vector<4x32x16xf32>
    "tpu.trace_start"() <{level = 10 : i32, message = "nsh,nhd->nsd"}> : () -> ()
    %cst_106 = arith.constant dense<0.000000e+00> : vector<4x8x16xf32>
    %184 = tpu.matmul %181, %183, %cst_106 {dimension_numbers = #tpu.dot_dimension_numbers<[2], [1], [1], [2], [0, 0, 0, 1, 1, 2], [0], [0]>} : vector<4x8x32xf32>, vector<4x32x16xf32>, vector<4x8x16xf32> -> vector<4x8x16xf32>
    "tpu.trace_stop"() : () -> ()
    %c1_107 = arith.constant 1 : index
    %c0_108 = arith.constant 0 : index
    %c0_109 = arith.constant 0 : index
    %c0_110 = arith.constant 0 : index
    %185 = vector.load %arg9[%c1_107, %c0_108, %c0_109, %c0_110] : memref<2x4x1x16xf32, #tpu.memory_space<vmem>>, vector<1x4x1x16xf32>
    %186 = vector.shape_cast %185 : vector<1x4x1x16xf32> to vector<4x1x16xf32>
    %187 = vector.broadcast %186 : vector<4x1x16xf32> to vector<4x8x16xf32>
    %188 = arith.addf %184, %187 : vector<4x8x16xf32>
    %c1_111 = arith.constant 1 : index
    %c0_112 = arith.constant 0 : index
    %c0_113 = arith.constant 0 : index
    %c0_114 = arith.constant 0 : index
    %189 = vector.load %arg10[%c1_111, %c0_112, %c0_113, %c0_114] : memref<2x4x32x16xf32, #tpu.memory_space<vmem>>, vector<1x4x32x16xf32>
    %190 = vector.shape_cast %189 : vector<1x4x32x16xf32> to vector<4x32x16xf32>
    "tpu.trace_start"() <{level = 10 : i32, message = "nsh,nhd->nsd"}> : () -> ()
    %cst_115 = arith.constant dense<0.000000e+00> : vector<4x8x16xf32>
    %191 = tpu.matmul %181, %190, %cst_115 {dimension_numbers = #tpu.dot_dimension_numbers<[2], [1], [1], [2], [0, 0, 0, 1, 1, 2], [0], [0]>} : vector<4x8x32xf32>, vector<4x32x16xf32>, vector<4x8x16xf32> -> vector<4x8x16xf32>
    "tpu.trace_stop"() : () -> ()
    %c1_116 = arith.constant 1 : index
    %c0_117 = arith.constant 0 : index
    %c0_118 = arith.constant 0 : index
    %c0_119 = arith.constant 0 : index
    %192 = vector.load %arg11[%c1_116, %c0_117, %c0_118, %c0_119] : memref<2x4x1x16xf32, #tpu.memory_space<vmem>>, vector<1x4x1x16xf32>
    %193 = vector.shape_cast %192 : vector<1x4x1x16xf32> to vector<4x1x16xf32>
    %194 = vector.broadcast %193 : vector<4x1x16xf32> to vector<4x8x16xf32>
    %195 = arith.addf %191, %194 : vector<4x8x16xf32>
    %c1_120 = arith.constant 1 : index
    %c0_121 = arith.constant 0 : index
    %c0_122 = arith.constant 0 : index
    %c0_123 = arith.constant 0 : index
    %196 = vector.load %arg12[%c1_120, %c0_121, %c0_122, %c0_123] : memref<2x4x32x16xf32, #tpu.memory_space<vmem>>, vector<1x4x32x16xf32>
    %197 = vector.shape_cast %196 : vector<1x4x32x16xf32> to vector<4x32x16xf32>
    "tpu.trace_start"() <{level = 10 : i32, message = "nsh,nhd->nsd"}> : () -> ()
    %cst_124 = arith.constant dense<0.000000e+00> : vector<4x8x16xf32>
    %198 = tpu.matmul %181, %197, %cst_124 {dimension_numbers = #tpu.dot_dimension_numbers<[2], [1], [1], [2], [0, 0, 0, 1, 1, 2], [0], [0]>} : vector<4x8x32xf32>, vector<4x32x16xf32>, vector<4x8x16xf32> -> vector<4x8x16xf32>
    "tpu.trace_stop"() : () -> ()
    %c1_125 = arith.constant 1 : index
    %c0_126 = arith.constant 0 : index
    %c0_127 = arith.constant 0 : index
    %c0_128 = arith.constant 0 : index
    %199 = vector.load %arg13[%c1_125, %c0_126, %c0_127, %c0_128] : memref<2x4x1x16xf32, #tpu.memory_space<vmem>>, vector<1x4x1x16xf32>
    %200 = vector.shape_cast %199 : vector<1x4x1x16xf32> to vector<4x1x16xf32>
    %201 = vector.broadcast %200 : vector<4x1x16xf32> to vector<4x8x16xf32>
    %202 = arith.addf %198, %201 : vector<4x8x16xf32>
    "tpu.trace_start"() <{level = 10 : i32, message = "nqd,nkd->nqk"}> : () -> ()
    %cst_129 = arith.constant dense<0.000000e+00> : vector<4x8x8xf32>
    %203 = tpu.matmul %188, %195, %cst_129 {dimension_numbers = #tpu.dot_dimension_numbers<[2], [2], [1], [1], [0, 0, 0, 1, 1, 1], [0], [0]>} : vector<4x8x16xf32>, vector<4x8x16xf32>, vector<4x8x8xf32> -> vector<4x8x8xf32>
    "tpu.trace_stop"() : () -> ()
    %cst_130 = arith.constant 2.500000e-01 : f32
    %204 = vector.broadcast %cst_130 : f32 to vector<4x8x8xf32>
    %205 = arith.mulf %203, %204 : vector<4x8x8xf32>
    %206 = arith.addf %205, %44 : vector<4x8x8xf32>
    %cst_131 = arith.constant dense<0xFF800000> : vector<4x8xf32>
    %207 = vector.multi_reduction <maximumf>, %206, %cst_131 [2] : vector<4x8x8xf32> to vector<4x8xf32>
    %208 = vector.shape_cast %207 : vector<4x8xf32> to vector<4x8x1xf32>
    %209 = vector.broadcast %208 : vector<4x8x1xf32> to vector<4x8x8xf32>
    %210 = arith.subf %206, %209 : vector<4x8x8xf32>
    %211 = math.exp %210 : vector<4x8x8xf32>
    %cst_132 = arith.constant dense<0.000000e+00> : vector<4x8xf32>
    %212 = vector.multi_reduction <add>, %211, %cst_132 [2] : vector<4x8x8xf32> to vector<4x8xf32>
    %213 = vector.shape_cast %212 : vector<4x8xf32> to vector<4x8x1xf32>
    %214 = tpu.reciprocal %213 {approx = true} : vector<4x8x1xf32> -> vector<4x8x1xf32>
    %215 = vector.broadcast %214 : vector<4x8x1xf32> to vector<4x8x8xf32>
    %216 = arith.mulf %211, %215 : vector<4x8x8xf32>
    "tpu.trace_start"() <{level = 10 : i32, message = "nqk,nkd->nqd"}> : () -> ()
    %cst_133 = arith.constant dense<0.000000e+00> : vector<4x8x16xf32>
    %217 = tpu.matmul %216, %202, %cst_133 {dimension_numbers = #tpu.dot_dimension_numbers<[2], [1], [1], [2], [0, 0, 0, 1, 1, 2], [0], [0]>} : vector<4x8x8xf32>, vector<4x8x16xf32>, vector<4x8x16xf32> -> vector<4x8x16xf32>
    "tpu.trace_stop"() : () -> ()
    %c1_134 = arith.constant 1 : index
    %c0_135 = arith.constant 0 : index
    %c0_136 = arith.constant 0 : index
    %c0_137 = arith.constant 0 : index
    %218 = vector.load %arg14[%c1_134, %c0_135, %c0_136, %c0_137] : memref<2x4x16x32xf32, #tpu.memory_space<vmem>>, vector<1x4x16x32xf32>
    %219 = vector.shape_cast %218 : vector<1x4x16x32xf32> to vector<4x16x32xf32>
    "tpu.trace_start"() <{level = 10 : i32, message = "nsd,ndh->nsh"}> : () -> ()
    %cst_138 = arith.constant dense<0.000000e+00> : vector<4x8x32xf32>
    %220 = tpu.matmul %217, %219, %cst_138 {dimension_numbers = #tpu.dot_dimension_numbers<[2], [1], [1], [2], [0, 0, 0, 1, 1, 2], [0], [0]>} : vector<4x8x16xf32>, vector<4x16x32xf32>, vector<4x8x32xf32> -> vector<4x8x32xf32>
    "tpu.trace_stop"() : () -> ()
    %221 = vector.shape_cast %220 : vector<4x8x32xf32> to vector<2x2x8x32xf32>
    %cst_139 = arith.constant dense<0.000000e+00> : vector<2x8x32xf32>
    %222 = vector.multi_reduction <add>, %221, %cst_139 [1] : vector<2x2x8x32xf32> to vector<2x8x32xf32>
    %223 = vector.shape_cast %222 : vector<2x8x32xf32> to vector<16x32xf32>
    %c1_140 = arith.constant 1 : index
    %c0_141 = arith.constant 0 : index
    %c0_142 = arith.constant 0 : index
    %224 = vector.load %arg15[%c1_140, %c0_141, %c0_142] : memref<2x1x32xf32, #tpu.memory_space<vmem>>, vector<1x1x32xf32>
    %225 = vector.shape_cast %224 : vector<1x1x32xf32> to vector<1x32xf32>
    %226 = vector.broadcast %225 : vector<1x32xf32> to vector<16x32xf32>
    %227 = arith.addf %223, %226 : vector<16x32xf32>
    %228 = arith.addf %227, %176 : vector<16x32xf32>
    %c1_143 = arith.constant 1 : index
    %c0_144 = arith.constant 0 : index
    %c0_145 = arith.constant 0 : index
    %229 = vector.load %arg16[%c1_143, %c0_144, %c0_145] : memref<2x1x32xf32, #tpu.memory_space<vmem>>, vector<1x1x32xf32>
    %230 = vector.shape_cast %229 : vector<1x1x32xf32> to vector<1x32xf32>
    %c1_146 = arith.constant 1 : index
    %c0_147 = arith.constant 0 : index
    %c0_148 = arith.constant 0 : index
    %231 = vector.load %arg17[%c1_146, %c0_147, %c0_148] : memref<2x1x32xf32, #tpu.memory_space<vmem>>, vector<1x1x32xf32>
    %232 = vector.shape_cast %231 : vector<1x1x32xf32> to vector<1x32xf32>
    %cst_149 = arith.constant dense<0.000000e+00> : vector<16xf32>
    %233 = vector.multi_reduction <add>, %228, %cst_149 [1] : vector<16x32xf32> to vector<16xf32>
    %234 = vector.shape_cast %233 : vector<16xf32> to vector<16x1xf32>
    %cst_150 = arith.constant 3.200000e+01 : f32
    %235 = vector.broadcast %cst_150 : f32 to vector<16x1xf32>
    %236 = arith.divf %234, %235 : vector<16x1xf32>
    %237 = vector.broadcast %236 : vector<16x1xf32> to vector<16x32xf32>
    %238 = arith.subf %228, %237 : vector<16x32xf32>
    %239 = arith.mulf %238, %238 : vector<16x32xf32>
    %cst_151 = arith.constant dense<0.000000e+00> : vector<16xf32>
    %240 = vector.multi_reduction <add>, %239, %cst_151 [1] : vector<16x32xf32> to vector<16xf32>
    %241 = vector.shape_cast %240 : vector<16xf32> to vector<16x1xf32>
    %cst_152 = arith.constant 3.200000e+01 : f32
    %242 = vector.broadcast %cst_152 : f32 to vector<16x1xf32>
    %243 = arith.divf %241, %242 : vector<16x1xf32>
    %244 = vector.broadcast %236 : vector<16x1xf32> to vector<16x32xf32>
    %245 = arith.subf %228, %244 : vector<16x32xf32>
    %cst_153 = arith.constant 9.99999974E-6 : f32
    %246 = vector.broadcast %cst_153 : f32 to vector<16x1xf32>
    %247 = arith.addf %243, %246 : vector<16x1xf32>
    %248 = math.rsqrt %247 : vector<16x1xf32>
    %249 = vector.broadcast %248 : vector<16x1xf32> to vector<16x32xf32>
    %250 = arith.mulf %245, %249 : vector<16x32xf32>
    %251 = vector.broadcast %230 : vector<1x32xf32> to vector<16x32xf32>
    %252 = arith.mulf %250, %251 : vector<16x32xf32>
    %253 = vector.broadcast %232 : vector<1x32xf32> to vector<16x32xf32>
    %254 = arith.addf %252, %253 : vector<16x32xf32>
    %c1_154 = arith.constant 1 : index
    %c0_155 = arith.constant 0 : index
    %c0_156 = arith.constant 0 : index
    %255 = vector.load %arg18[%c1_154, %c0_155, %c0_156] : memref<2x32x64xf32, #tpu.memory_space<vmem>>, vector<1x32x64xf32>
    %256 = vector.shape_cast %255 : vector<1x32x64xf32> to vector<32x64xf32>
    %cst_157 = arith.constant dense<0.000000e+00> : vector<16x64xf32>
    %257 = tpu.matmul %254, %256, %cst_157 {dimension_numbers = #tpu.dot_dimension_numbers<[1], [0], [0], [1], [0, 0, 1, 1], [], []>} : vector<16x32xf32>, vector<32x64xf32>, vector<16x64xf32> -> vector<16x64xf32>
    %c1_158 = arith.constant 1 : index
    %c0_159 = arith.constant 0 : index
    %c0_160 = arith.constant 0 : index
    %258 = vector.load %arg19[%c1_158, %c0_159, %c0_160] : memref<2x1x64xf32, #tpu.memory_space<vmem>>, vector<1x1x64xf32>
    %259 = vector.shape_cast %258 : vector<1x1x64xf32> to vector<1x64xf32>
    %260 = vector.broadcast %259 : vector<1x64xf32> to vector<16x64xf32>
    %261 = arith.addf %257, %260 : vector<16x64xf32>
    %cst_161 = arith.constant 5.000000e-01 : f32
    %262 = vector.broadcast %cst_161 : f32 to vector<16x64xf32>
    %263 = arith.mulf %262, %261 : vector<16x64xf32>
    %cst_162 = arith.constant 4.471500e-02 : f32
    %264 = vector.broadcast %cst_162 : f32 to vector<16x64xf32>
    %265 = arith.mulf %264, %261 : vector<16x64xf32>
    %266 = arith.mulf %265, %261 : vector<16x64xf32>
    %267 = arith.mulf %266, %261 : vector<16x64xf32>
    %268 = arith.addf %261, %267 : vector<16x64xf32>
    %cst_163 = arith.constant 0.797884583 : f32
    %269 = vector.broadcast %cst_163 : f32 to vector<16x64xf32>
    %270 = arith.mulf %269, %268 : vector<16x64xf32>
    %271 = math.tanh %270 : vector<16x64xf32>
    %cst_164 = arith.constant 1.000000e+00 : f32
    %272 = vector.broadcast %cst_164 : f32 to vector<16x64xf32>
    %273 = arith.addf %272, %271 : vector<16x64xf32>
    %274 = arith.mulf %263, %273 : vector<16x64xf32>
    %c1_165 = arith.constant 1 : index
    %c0_166 = arith.constant 0 : index
    %c0_167 = arith.constant 0 : index
    %275 = vector.load %arg20[%c1_165, %c0_166, %c0_167] : memref<2x64x32xf32, #tpu.memory_space<vmem>>, vector<1x64x32xf32>
    %276 = vector.shape_cast %275 : vector<1x64x32xf32> to vector<64x32xf32>
    %cst_168 = arith.constant dense<0.000000e+00> : vector<16x32xf32>
    %277 = tpu.matmul %274, %276, %cst_168 {dimension_numbers = #tpu.dot_dimension_numbers<[1], [0], [0], [1], [0, 0, 1, 1], [], []>} : vector<16x64xf32>, vector<64x32xf32>, vector<16x32xf32> -> vector<16x32xf32>
    %c1_169 = arith.constant 1 : index
    %c0_170 = arith.constant 0 : index
    %c0_171 = arith.constant 0 : index
    %278 = vector.load %arg21[%c1_169, %c0_170, %c0_171] : memref<2x1x32xf32, #tpu.memory_space<vmem>>, vector<1x1x32xf32>
    %279 = vector.shape_cast %278 : vector<1x1x32xf32> to vector<1x32xf32>
    %280 = vector.broadcast %279 : vector<1x32xf32> to vector<16x32xf32>
    %281 = arith.addf %277, %280 : vector<16x32xf32>
    %282 = arith.addf %281, %254 : vector<16x32xf32>
    %c1_172 = arith.constant 1 : index
    %c0_173 = arith.constant 0 : index
    %c0_174 = arith.constant 0 : index
    %283 = vector.load %arg22[%c1_172, %c0_173, %c0_174] : memref<2x1x32xf32, #tpu.memory_space<vmem>>, vector<1x1x32xf32>
    %284 = vector.shape_cast %283 : vector<1x1x32xf32> to vector<1x32xf32>
    %c1_175 = arith.constant 1 : index
    %c0_176 = arith.constant 0 : index
    %c0_177 = arith.constant 0 : index
    %285 = vector.load %arg23[%c1_175, %c0_176, %c0_177] : memref<2x1x32xf32, #tpu.memory_space<vmem>>, vector<1x1x32xf32>
    %286 = vector.shape_cast %285 : vector<1x1x32xf32> to vector<1x32xf32>
    %cst_178 = arith.constant dense<0.000000e+00> : vector<16xf32>
    %287 = vector.multi_reduction <add>, %282, %cst_178 [1] : vector<16x32xf32> to vector<16xf32>
    %288 = vector.shape_cast %287 : vector<16xf32> to vector<16x1xf32>
    %cst_179 = arith.constant 3.200000e+01 : f32
    %289 = vector.broadcast %cst_179 : f32 to vector<16x1xf32>
    %290 = arith.divf %288, %289 : vector<16x1xf32>
    %291 = vector.broadcast %290 : vector<16x1xf32> to vector<16x32xf32>
    %292 = arith.subf %282, %291 : vector<16x32xf32>
    %293 = arith.mulf %292, %292 : vector<16x32xf32>
    %cst_180 = arith.constant dense<0.000000e+00> : vector<16xf32>
    %294 = vector.multi_reduction <add>, %293, %cst_180 [1] : vector<16x32xf32> to vector<16xf32>
    %295 = vector.shape_cast %294 : vector<16xf32> to vector<16x1xf32>
    %cst_181 = arith.constant 3.200000e+01 : f32
    %296 = vector.broadcast %cst_181 : f32 to vector<16x1xf32>
    %297 = arith.divf %295, %296 : vector<16x1xf32>
    %298 = vector.broadcast %290 : vector<16x1xf32> to vector<16x32xf32>
    %299 = arith.subf %282, %298 : vector<16x32xf32>
    %cst_182 = arith.constant 9.99999974E-6 : f32
    %300 = vector.broadcast %cst_182 : f32 to vector<16x1xf32>
    %301 = arith.addf %297, %300 : vector<16x1xf32>
    %302 = math.rsqrt %301 : vector<16x1xf32>
    %303 = vector.broadcast %302 : vector<16x1xf32> to vector<16x32xf32>
    %304 = arith.mulf %299, %303 : vector<16x32xf32>
    %305 = vector.broadcast %284 : vector<1x32xf32> to vector<16x32xf32>
    %306 = arith.mulf %304, %305 : vector<16x32xf32>
    %307 = vector.broadcast %286 : vector<1x32xf32> to vector<16x32xf32>
    %308 = arith.addf %306, %307 : vector<16x32xf32>
    %309 = vector.extract_strided_slice %308 {offsets = [0, 0], sizes = [1, 32], strides = [1, 1]} : vector<16x32xf32> to vector<1x32xf32>
    %310 = vector.extract_strided_slice %308 {offsets = [8, 0], sizes = [1, 32], strides = [1, 1]} : vector<16x32xf32> to vector<1x32xf32>
    %311 = tpu.concatenate %309, %310 in 0 : vector<1x32xf32>, vector<1x32xf32> -> vector<2x32xf32>
    %c0_183 = arith.constant 0 : index
    %c0_184 = arith.constant 0 : index
    %312 = vector.load %arg24[%c0_183, %c0_184] : memref<32x32xf32, #tpu.memory_space<vmem>>, vector<32x32xf32>
    %cst_185 = arith.constant dense<0.000000e+00> : vector<2x32xf32>
    %313 = tpu.matmul %311, %312, %cst_185 {dimension_numbers = #tpu.dot_dimension_numbers<[1], [0], [0], [1], [0, 0, 1, 1], [], []>} : vector<2x32xf32>, vector<32x32xf32>, vector<2x32xf32> -> vector<2x32xf32>
    %c0_186 = arith.constant 0 : index
    %c0_187 = arith.constant 0 : index
    %314 = vector.load %arg25[%c0_186, %c0_187] : memref<1x32xf32, #tpu.memory_space<vmem>>, vector<1x32xf32>
    %315 = vector.broadcast %314 : vector<1x32xf32> to vector<2x32xf32>
    %316 = arith.addf %313, %315 : vector<2x32xf32>
    %317 = math.tanh %316 : vector<2x32xf32>
    %c0_188 = arith.constant 0 : index
    %c0_189 = arith.constant 0 : index
    %318 = vector.load %arg26[%c0_188, %c0_189] : memref<32x2xf32, #tpu.memory_space<vmem>>, vector<32x2xf32>
    %cst_190 = arith.constant dense<0.000000e+00> : vector<2x2xf32>
    %319 = tpu.matmul %317, %318, %cst_190 {dimension_numbers = #tpu.dot_dimension_numbers<[1], [0], [0], [1], [0, 0, 1, 1], [], []>} : vector<2x32xf32>, vector<32x2xf32>, vector<2x2xf32> -> vector<2x2xf32>
    %c0_191 = arith.constant 0 : index
    %c0_192 = arith.constant 0 : index
    %320 = vector.load %arg27[%c0_191, %c0_192] : memref<1x2xf32, #tpu.memory_space<vmem>>, vector<1x2xf32>
    %321 = vector.broadcast %320 : vector<1x2xf32> to vector<2x2xf32>
    %322 = arith.addf %319, %321 : vector<2x2xf32>
    %c0_193 = arith.constant 0 : index
    %c0_194 = arith.constant 0 : index
    %323 = vector.load %arg28[%c0_193, %c0_194] : memref<2x2xf32, #tpu.memory_space<vmem>>, vector<2x2xf32>
    tpu.vector_store %arg28[%c0_193, %c0_194], %322 {strides = array<i32>} : memref<2x2xf32, #tpu.memory_space<vmem>>, vector<2x2xf32>,
    return
  }
}

</mosaic_0001>

<bundles_post_ra>
// kernel: classifier_forward.1
= control target key start
LH: loop header
LB: loop body
LE: loop exit
PB: predicated region body
PF: predicated region fallthrough
CT: control target
= control target key end

     0   :  { %s3518_s0 = inlined_call_operand.vmem [shape: s32[16,1], index: 0, kind: input, shape index: {}]   ;;  %s3519_s1 = inlined_call_operand.vmem [shape: s32[16,1], index: 1, kind: input, shape index: {}]   ;;  %s3520_s2 = inlined_call_operand.vmem [shape: f32[4,8,8], index: 2, kind: input, shape index: {}]   ;;  %s3521_s3 = inlined_call_operand.vmem [shape: f32[100,32], index: 3, kind: input, shape index: {}]   ;;  %s3522_s4 = inlined_call_operand.vmem [shape: f32[64,32], index: 4, kind: input, shape index: {}]   ;;  %s3523_s5 = inlined_call_operand.vmem [shape: f32[1,32], index: 5, kind: input, shape index: {}]   ;;  %s3524_s6 = inlined_call_operand.vmem [shape: f32[1,32], index: 6, kind: input, shape index: {}]   ;;  %s3525_s7 = inlined_call_operand.vmem [shape: f32[1,32], index: 7, kind: input, shape index: {}]   ;;  %s3526_s8 = inlined_call_operand.vmem [shape: f32[2,4,32,16], index: 8, kind: input, shape index: {}]   ;;  %s3527_s9 = inlined_call_operand.vmem [shape: f32[2,4,1,16], index: 9, kind: input, shape index: {}]   ;;  %s3528_s10 = inlined_call_operand.vmem [shape: f32[2,4,32,16], index: 10, kind: input, shape index: {}]   ;;  %s3529_s11 = inlined_call_operand.vmem [shape: f32[2,4,1,16], index: 11, kind: input, shape index: {}]   ;;  %s3530_s12 = inlined_call_operand.vmem [shape: f32[2,4,32,16], index: 12, kind: input, shape index: {}]   ;;  %s3531_s13 = inlined_call_operand.vmem [shape: f32[2,4,1,16], index: 13, kind: input, shape index: {}]   ;;  %s3532_s14 = inlined_call_operand.vmem [shape: f32[2,4,16,32], index: 14, kind: input, shape index: {}]   ;;  %s3533_s15 = inlined_call_operand.vmem [shape: f32[2,1,32], index: 15, kind: input, shape index: {}]   ;;  %s3534_s16 = inlined_call_operand.vmem [shape: f32[2,1,32], index: 16, kind: input, shape index: {}]   ;;  %s3535_s17 = inlined_call_operand.vmem [shape: f32[2,1,32], index: 17, kind: input, shape index: {}]   ;;  %s3536_s18 = inlined_call_operand.vmem [shape: f32[2,32,64], index: 18, kind: input, shape index: {}]   ;;  %s3537_s19 = inlined_call_operand.vmem [shape: f32[2,1,64], index: 19, kind: input, shape index: {}]   ;;  %s3538_s20 = inlined_call_operand.vmem [shape: f32[2,64,32], index: 20, kind: input, shape index: {}]   ;;  %s3539_s21 = inlined_call_operand.vmem [shape: f32[2,1,32], index: 21, kind: input, shape index: {}]   ;;  %s3540_s22 = inlined_call_operand.vmem [shape: f32[2,1,32], index: 22, kind: input, shape index: {}]   ;;  %s3541_s23 = inlined_call_operand.vmem [shape: f32[2,1,32], index: 23, kind: input, shape index: {}]   ;;  %s3542_s24 = inlined_call_operand.vmem [shape: f32[32,32], index: 24, kind: input, shape index: {}]   ;;  %s3543_s25 = inlined_call_operand.vmem [shape: f32[1,32], index: 25, kind: input, shape index: {}]   ;;  %s3544_s26 = inlined_call_operand.vmem [shape: f32[32,2], index: 26, kind: input, shape index: {}]   ;;  %s3545_s27 = inlined_call_operand.vmem [shape: f32[1,2], index: 27, kind: input, shape index: {}]   ;;  %s3546_s28 = inlined_call_operand.hbm [shape: f32[2,2], index: 28, kind: output, shape index: {}]  }
   0x1   :  { %3557 = sst [smem:[#allocation5_spill]] %s3518_s0 }
   0x2   :  { %3558 = sst [smem:[#allocation6_spill]] %s3519_s1 }
   0x3   :  { %3559 = sst [smem:[#allocation7_spill]] %s3520_s2 }
   0x4   :  { %3560 = sst [smem:[#allocation8_spill]] %s3521_s3 }
   0x5   :  { %3561 = sst [smem:[#allocation9_spill]] %s3522_s4 }
   0x6   :  { %3562 = sst [smem:[#allocation10_spill]] %s3523_s5 }
   0x7   :  { %3563 = sst [smem:[#allocation11_spill]] %s3524_s6 }
   0x8   :  { %3564 = sst [smem:[#allocation12_spill]] %s3525_s7 }
   0x9   :  { %3565 = sst [smem:[#allocation13_spill]] %s3526_s8 }
   0xa   :  { %3566 = sst [smem:[#allocation14_spill]] %s3527_s9 }
   0xb   :  { %3567 = sst [smem:[#allocation15_spill]] %s3528_s10 }
   0xc   :  { %3568 = sst [smem:[#allocation16_spill]] %s3529_s11 }
   0xd   :  { %3569 = sst [smem:[#allocation17_spill]] %s3530_s12 }
   0xe   :  { %s3570_s9 = sld [smem:[#allocation5_spill]]  ;;  %vm178_vm0 = vcmask 1043456   ;;  %v2512_v2 = vmov 0  }
   0xf   :  { %2378 = vset.pattern.permute.xlu1 %v2512_v2  ;;  %2377 = vset.pattern.permute.xlu0 %v2512_v2  ;;  %s3571_s0 = sld [smem:[#allocation8_spill]] }
  0x10   :  { %s3572_s4 = sld [smem:[#allocation9_spill]] }
  0x14   :  { %v91_v0 = vld [vmem:[%s3570_s9 + $0x8] sm:$0xff]  ;;  %v90_v1 = vld [vmem:[%s3570_s9] sm:$0xff]  ;;  %s3573_s9 = sld [smem:[#allocation6_spill]] }
  0x15   :  { %v118_v3 = vld [vmem:[%s3571_s0 + $0x60] sm:$0xf]  ;;  %98 = vperm.xlu1 %2378, %v91_v0   ;;  %95 = vperm.xlu0 %2377, %v90_v1   ;;  %v117_v4 = vld [vmem:[%s3571_s0 + $0x58] sm:$0xff]  ;;  %v116_v5 = vld [vmem:[%s3571_s0 + $0x50] sm:$0xff] }
  0x16   :  { %2217 = vmatpush.msk.msra.mxu1 %vm178_vm0, %v118_v3  ;;  %v140_v6 = vld [vmem:[%s3572_s4 + $0x38] sm:$0xff]  ;;  %v115_v9 = vld [vmem:[%s3571_s0 + $0x48] sm:$0xff]  ;;  %v139_v10 = vld [vmem:[%s3572_s4 + $0x30] sm:$0xff] }
  0x17   :  { %156 = vmatpush.msra.mxu0 %v140_v6  ;;  %v114_v11 = vld [vmem:[%s3571_s0 + $0x40] sm:$0xff]  ;;  %v138_v12 = vld [vmem:[%s3572_s4 + $0x28] sm:$0xff]  ;;  %v113_v13 = vld [vmem:[%s3571_s0 + $0x38] sm:$0xff] }
  0x18   :  { %186 = vmatpush.msra.mxu1 %v117_v4  ;;  %v112_v14 = vld [vmem:[%s3571_s0 + $0x30] sm:$0xff]  ;;  %v111_v15 = vld [vmem:[%s3571_s0 + $0x28] sm:$0xff]  ;;  %v110_v16 = vld [vmem:[%s3571_s0 + $0x20] sm:$0xff] }
  0x19   :  { %157 = vmatpush.msra.mxu0 %v139_v10  ;;  %v109_v17 = vld [vmem:[%s3571_s0 + $0x18] sm:$0xff]  ;;  %v108_v18 = vld [vmem:[%s3571_s0 + $0x10] sm:$0xff] }
  0x1a   :  { %v120_v7 = vld [vmem:[%s3573_s9 + $0x8] sm:$0xff]  ;;  %v119_v8 = vld [vmem:[%s3573_s9] sm:$0xff]  ;;  %187 = vmatpush.msra.mxu1 %v116_v5 }
  0x1b   :  { %158 = vmatpush.msra.mxu0 %v138_v12 }
  0x1c   :  { %188 = vmatpush.msra.mxu1 %v115_v9 }
  0x1d   :  { %125 = vperm.xlu1 %2378, %v120_v7   ;;  %122 = vperm.xlu0 %2377, %v119_v8  }
  0x1e   :  { %189 = vmatpush.msra.mxu1 %v114_v11 }
  0x20   :  { %190 = vmatpush.msra.mxu1 %v113_v13 }
  0x22   :  { %191 = vmatpush.msra.mxu1 %v112_v14 }
  0x24   :  { %192 = vmatpush.msra.mxu1 %v111_v15 }
  0x26   :  { %193 = vmatpush.msra.mxu1 %v110_v16 }
  0x27   :  { %33 = vsyncpa [#allocation3], 0  ;;  %v107_v19 = vld [vmem:[%s3571_s0 + $0x8] sm:$0xff]  ;;  %v137_v20 = vld [vmem:[%s3572_s4 + $0x20] sm:$0xff]  ;;  %v92_v26 = vlaneseq  ;;  %vm171_vm1 = vcmask 818176   ;;  %v2513_v30 = vmov 0.0  }
  0x28   :  { %194 = vmatpush.msra.mxu1 %v109_v17  ;;  %v106_v21 = vld [vmem:[%s3571_s0] sm:$0xff]  ;;  %159 = vmatpush.msra.mxu0 %v137_v20  ;;  %v136_v22 = vld [vmem:[%s3572_s4 + $0x18] sm:$0xff]  ;;  %v135_v23 = vld [vmem:[%s3572_s4 + $0x10] sm:$0xff]  ;;  %vm141_vm4 = vcmask 523264   ;;  %s3574_s8 = sld [smem:[#allocation10_spill]]  ;;  %vm213_vm7 = vcmask 261120  }
  0x29   :  { %v134_v24 = vld [vmem:[%s3572_s4 + $0x8] sm:$0xff]  ;;  %v133_v25 = vld [vmem:[%s3572_s4] sm:$0xff]  ;;  %v93_v27 = vand.u32 127, %v92_v26  ;;  %v2514_v48 = vmov 32.0   ;;  %s3575_s30 = sld [smem:[#allocation13_spill]]  ;;  %vm621_vm15 = vcmask 130048  }
  0x2a   :  { %195 = vmatpush.msra.mxu1 %v108_v18  ;;  %160 = vmatpush.msra.mxu0 %v136_v22  ;;  %2422 = vrcp.f32 %v2514_v48  ;;  %s3576_s10 = sld [smem:[#allocation15_spill]]  ;;  %vm734_vm0 = vcmask 64512  }
  0x2b   :  { %s3577_s1 = sld [smem:[#allocation17_spill]] }
  0x2c   :  { %196 = vmatpush.msra.mxu1 %v107_v19  ;;  %161 = vmatpush.msra.mxu0 %v135_v23  ;;  %s3578_s9 = sld [smem:[#allocation11_spill]] }
  0x2d   :  { %s3579_s11 = sld [smem:[#allocation12_spill]] }
  0x2e   :  { %197 = vmatpush.msra.mxu1 %v106_v21  ;;  %162 = vmatpush.msra.mxu0 %v134_v24  ;;  %v2379_v42 = vld [vmem:[%s3574_s8] ss:$0 sm:$0xff]  ;;  %s3580_s7 = sld [smem:[#allocation16_spill]] }
  0x2f   :  { %v290_v1 = vld [vmem:[%s3575_s30 + $0x58] sm:$0xff]  ;;  %v289_v3 = vld [vmem:[%s3575_s30 + $0x50] sm:$0xff]  ;;  %v288_v5 = vld [vmem:[%s3575_s30 + $0x48] sm:$0xff]  ;;  %s3581_s4 = sld [smem:[#allocation14_spill]] }
  0x30   :  { %163 = vmatpush.msra.mxu0 %v133_v25  ;;  %v2423_v49 = vpop.eup %2422  ;;  %v408_v2 = vld [vmem:[%s3576_s10 + $0x58] sm:$0xff]  ;;  %369 = vmatpush.msra.mxu2 %v290_v1  ;;  %v407_v4 = vld [vmem:[%s3576_s10 + $0x50] sm:$0xff]  ;;  %v406_v6 = vld [vmem:[%s3576_s10 + $0x48] sm:$0xff] }
  0x31   :  { %v221_v50 = vmul.f32 32.0, %v2423_v49  ;;  %vm225_vm8 = vweird.f32 %v2423_v49  ;;  %v287_v7 = vld [vmem:[%s3575_s30 + $0x40] sm:$0xff]  ;;  %v282_v9 = vld [vmem:[%s3575_s30 + $0x18] sm:$0xff]  ;;  %v281_v12 = vld [vmem:[%s3575_s30 + $0x10] sm:$0xff] }
  0x32   :  { %481 = vmatpush.msrb.mxu0 %v408_v2  ;;  %370 = vmatpush.msra.mxu2 %v289_v3  ;;  %v405_v8 = vld [vmem:[%s3576_s10 + $0x40] sm:$0xff]  ;;  %v400_v10 = vld [vmem:[%s3576_s10 + $0x18] sm:$0xff]  ;;  %v399_v13 = vld [vmem:[%s3576_s10 + $0x10] sm:$0xff] }
  0x33   :  { %v222_v51 = vsub.f32 1.0, %v221_v50  ;;  %v516_v11 = vld [vmem:[%s3577_s1 + $0x38] sm:$0xff]  ;;  %326 = vmatpush.msra.mxu3 %v282_v9  ;;  %v515_v14 = vld [vmem:[%s3577_s1 + $0x30] sm:$0xff]  ;;  %v280_v17 = vld [vmem:[%s3575_s30 + $0x8] sm:$0xff] }
  0x34   :  { %482 = vmatpush.msrb.mxu0 %v407_v4  ;;  %371 = vmatpush.msra.mxu2 %v288_v5  ;;  %v398_v18 = vld [vmem:[%s3576_s10 + $0x8] sm:$0xff]  ;;  %v279_v21 = vld [vmem:[%s3575_s30] sm:$0xff]  ;;  %v286_v24 = vld [vmem:[%s3575_s30 + $0x38] sm:$0xff] }
  0x35   :  { %v223_v52 = vmul.f32 %v2423_v49, %v222_v51  ;;  %327 = vmatpush.msra.mxu3 %v281_v12  ;;  %v514_v19 = vld [vmem:[%s3577_s1 + $0x28] sm:$0xff]  ;;  %v397_v22 = vld [vmem:[%s3576_s10] sm:$0xff]  ;;  %v285_v25 = vld [vmem:[%s3575_s30 + $0x30] sm:$0xff] }
  0x36   :  { %483 = vmatpush.msrb.mxu0 %v406_v6  ;;  %372 = vmatpush.msra.mxu2 %v287_v7  ;;  %v513_v23 = vld [vmem:[%s3577_s1 + $0x20] sm:$0xff]  ;;  %v412_v48 = vld [vmem:[%s3576_s10 + $0x78] sm:$0xff]  ;;  %v411_v50 = vld [vmem:[%s3576_s10 + $0x70] sm:$0xff] }
  0x37   :  { %v224_v53 = vadd.f32 %v2423_v49, %v223_v52  ;;  %328 = vmatpush.msra.mxu3 %v280_v17  ;;  %v517_v1 = vld [vmem:[%s3577_s1 + $0x40] sm:$0xff]  ;;  %v404_v2 = vld [vmem:[%s3576_s10 + $0x38] sm:$0xff]  ;;  %v403_v3 = vld [vmem:[%s3576_s10 + $0x30] sm:$0xff] }
  0x38   :  { %484 = vmatpush.msrb.mxu0 %v405_v8  ;;  %441 = vmatpush.msrb.mxu2 %v400_v10  ;;  %v402_v4 = vld [vmem:[%s3576_s10 + $0x28] sm:$0xff]  ;;  %v401_v5 = vld [vmem:[%s3576_s10 + $0x20] sm:$0xff]  ;;  %v512_v6 = vld [vmem:[%s3577_s1 + $0x18] sm:$0xff] }
  0x39   :  { %v2743_v54 = vsel %vm225_vm8, %v2423_v49, %v224_v53  ;;  %329 = vmatpush.msra.mxu3 %v279_v21  ;;  %v410_v53 = vld [vmem:[%s3576_s10 + $0x68] sm:$0xff]  ;;  %v511_v7 = vld [vmem:[%s3577_s1 + $0x10] sm:$0xff]  ;;  %v509_v9 = vld [vmem:[%s3577_s1] sm:$0xff] }
  0x3a   :  { %442 = vmatpush.msrb.mxu2 %v399_v13  ;;  %v510_v8 = vld [vmem:[%s3577_s1 + $0x8] sm:$0xff]  ;;  %v524_v10 = vld [vmem:[%s3577_s1 + $0x78] sm:$0xff]  ;;  %v521_v13 = vld [vmem:[%s3577_s1 + $0x60] sm:$0xff] }
  0x3b   :  { %346 = vmatpush.msrb.mxu3 %v286_v24  ;;  %v522_v12 = vld [vmem:[%s3577_s1 + $0x68] sm:$0xff]  ;;  %v2383_v17 = vld [vmem:[%s3581_s4 + $0x2] ss:$0 sm:$0xff]  ;;  %v2385_v21 = vld [vmem:[%s3581_s4] ss:$0 sm:$0xff] }
  0x3c   :  { %443 = vmatpush.msrb.mxu2 %v398_v18 }
  0x3d   :  { %347 = vmatpush.msrb.mxu3 %v285_v25 }
  0x3e   :  { %444 = vmatpush.msrb.mxu2 %v397_v22 }
  0x87   :  { %v96_v28 = vpop.permute.xlu0 %95  ;;  %v99_v29 = vpop.permute.xlu1 %98 }
  0x88   :  { %vm100_vm2 = vcmp.eq.s32.totalorder %v96_v28, %v93_v27  ;;  %vm101_vm3 = vcmp.eq.s32.totalorder %v99_v29, %v93_v27  ;;  %v283_v29 = vld [vmem:[%s3575_s30 + $0x20] sm:$0xff] }
  0x89   :  { %v2211_v31 = vsel %vm100_vm2, 1.0, %v2513_v30  ;;  %v2212_v32 = vsel %vm101_vm3, 1.0, %v2513_v30 }
  0x8a   :  { %2218 = vmatmul.msk.f32.vlgmr.msra.gmra.mxu1 %vm171_vm1, %v2211_v31 }
  0x8f   :  { %v123_v33 = vpop.permute.xlu0 %122  ;;  %v126_v35 = vpop.permute.xlu1 %125 }
  0x90   :  { %vm127_vm5 = vcmp.eq.s32.totalorder %v123_v33, %v93_v27  ;;  %vm128_vm6 = vcmp.eq.s32.totalorder %v126_v35, %v93_v27  ;;  %v284_v27 = vld [vmem:[%s3575_s30 + $0x28] sm:$0xff] }
  0x91   :  { %v2213_v34 = vsel %vm127_vm5, 1.0, %v2513_v30  ;;  %v2214_v36 = vsel %vm128_vm6, 1.0, %v2513_v30  ;;  %348 = vmatpush.msrb.mxu3 %v284_v27 }
  0x92   :  { %2215 = vmatmul.msk.f32.vlgmr.msra.gmra.mxu0 %vm141_vm4, %v2213_v34  ;;  %2219 = vmatmul.msk.f32.gmra.mxu1 %vm171_vm1, %v2212_v32 }
  0x93   :  { %573 = vmatpush.msra.mxu0 %v516_v11  ;;  %349 = vmatpush.msrb.mxu3 %v283_v29  ;;  %v523_v11 = vld [vmem:[%s3577_s1 + $0x70] sm:$0xff] }
  0x95   :  { %574 = vmatpush.msra.mxu0 %v515_v14  ;;  %v2382_v14 = vld [vmem:[%s3580_s7 + $0x2] ss:$0 sm:$0xff] }
  0x97   :  { %575 = vmatpush.msra.mxu0 %v514_v19 }
  0x99   :  { %576 = vmatpush.msra.mxu0 %v513_v23 }
  0x9a   :  { %2216 = vmatmul.msk.f32.gmra.mxu0 %vm141_vm4, %v2214_v36 }
 0x107   :  { %v199_v37 = vpop.f32.mrf.mxu1 }
 0x10f   :  { %v165_v38 = vpop.f32.mrf.mxu0  ;;  %v202_v39 = vpop.f32.mrf.mxu1 }
 0x110   :  { %v200_v44 = vadd.f32 %v199_v37, %v165_v38 }
 0x112   :  { %v209_v46 = vadd.f32 %v2379_v42, %v200_v44 }
 0x114   :  { %v214_v47 = vsel %vm213_vm7, %v209_v46, 0.0 }
 0x117   :  { %v168_v40 = vpop.f32.mrf.mxu0 }
 0x118   :  { %v203_v41 = vadd.f32 %v202_v39, %v168_v40  ;;  %v2380_v39 = vld [vmem:[%s3578_s9] ss:$0 sm:$0xff]  ;;  %s3582_s9 = sld [smem:[#allocation7_spill]] }
 0x11a   :  { %v210_v43 = vadd.f32 %v2379_v42, %v203_v41  ;;  %v2381_v42 = vld [vmem:[%s3579_s11] ss:$0 sm:$0xff] }
 0x11c   :  { %v217_v45 = vsel %vm213_vm7, %v210_v43, 0.0 }
 0x11d   :  { %218 = vadd.xlane.f32.xlu2 %v217_v45 }
 0x125   :  { %215 = vadd.xlane.f32.xlu2 %v214_v47 }
 0x190   :  { %v219_v55 = vpop.xlane.xlu2 %218 }
 0x191   :  { %v228_v56 = vmul.f32 %v2743_v54, %v219_v55 }
 0x193   :  { %v2746_v57 = vsub.f32 %v210_v43, %v228_v56  ;;  %v409_v56 = vld [vmem:[%s3576_s10 + $0x60] sm:$0xff] }
 0x195   :  { %v232_v58 = vmul.f32 %v2746_v57, %v2746_v57 }
 0x197   :  { %v236_v59 = vsel %vm213_vm7, %v232_v58, 0.0  ;;  %v294_v58 = vld [vmem:[%s3575_s30 + $0x78] sm:$0xff] }
 0x198   :  { %237 = vadd.xlane.f32.xlu0 %v236_v59  ;;  %v216_v60 = vpop.xlane.xlu2 %215  ;;  %v520_v59 = vld [vmem:[%s3577_s1 + $0x58] sm:$0xff] }
 0x199   :  { %v227_v61 = vmul.f32 %v2743_v54, %v216_v60  ;;  %v293_v60 = vld [vmem:[%s3575_s30 + $0x70] sm:$0xff] }
 0x19b   :  { %v2752_v62 = vsub.f32 %v209_v46, %v227_v61  ;;  %v519_v61 = vld [vmem:[%s3577_s1 + $0x50] sm:$0xff] }
 0x19d   :  { %v231_v63 = vmul.f32 %v2752_v62, %v2752_v62 }
 0x19f   :  { %v233_v0 = vsel %vm213_vm7, %v231_v63, 0.0  ;;  %v518_v63 = vld [vmem:[%s3577_s1 + $0x48] sm:$0xff] }
 0x1a0   :  { %234 = vadd.xlane.f32.xlu1 %v233_v0  ;;  %v291_v0 = vld [vmem:[%s3575_s30 + $0x60] sm:$0xff] }
 0x20b   :  { %v238_v15 = vpop.xlane.xlu0 %237 }
 0x20c   :  { %v240_v16 = vmul.f32 %v238_v15, %v2743_v54 }
 0x20e   :  { %v242_v20 = vadd.f32 1e-05, %v240_v16 }
 0x210   :  { %2424 = vrsqrt.f32 %v242_v20  ;;  %vm259_vm10 = vweird.f32 %v242_v20 }
 0x213   :  { %v235_v26 = vpop.xlane.xlu1 %234 }
 0x214   :  { %v239_v28 = vmul.f32 %v235_v26, %v2743_v54  ;;  %v2388_v26 = vld [vmem:[%s3580_s7 + $0x3] ss:$0 sm:$0xff] }
 0x216   :  { %v2425_v30 = vpop.eup %2424  ;;  %v241_v31 = vadd.f32 1e-05, %v239_v28 }
 0x217   :  { %v254_v32 = vmul.f32 %v2425_v30, %v242_v20  ;;  %vm260_vm9 = vweird.f32 %v2425_v30  ;;  %v2386_v20 = vld [vmem:[%s3580_s7] ss:$0 sm:$0xff] }
 0x218   :  { %2426 = vrsqrt.f32 %v241_v31  ;;  %vm261_vm11 = vmor %vm259_vm10, %vm260_vm9  ;;  %vm249_vm13 = vweird.f32 %v241_v31 }
 0x219   :  { %v255_v33 = vmul.f32 %v2425_v30, %v254_v32 }
 0x21b   :  { %v256_v34 = vmul.f32 0.5, %v255_v33 }
 0x21d   :  { %v257_v35 = vsub.f32 1.5, %v256_v34 }
 0x21e   :  { %v2427_v36 = vpop.eup %2426 }
 0x21f   :  { %v258_v37 = vmul.f32 %v2425_v30, %v257_v35  ;;  %v244_v38 = vmul.f32 %v2427_v36, %v241_v31  ;;  %vm250_vm12 = vweird.f32 %v2427_v36  ;;  %v2390_v31 = vld [vmem:[%s3531_s13 + $0x2] ss:$0 sm:$0xff] }
 0x220   :  { %vm251_vm14 = vmor %vm249_vm13, %vm250_vm12 }
 0x221   :  { %v262_v40 = vsel %vm261_vm11, %v2425_v30, %v258_v37  ;;  %v245_v41 = vmul.f32 %v2427_v36, %v244_v38  ;;  %v2389_v30 = vld [vmem:[%s3581_s4 + $0x3] ss:$0 sm:$0xff]  ;;  %v2384_v37 = vld [vmem:[%s3531_s13 + $0x1] ss:$0 sm:$0xff] }
 0x222   :  { %v264_v43 = vmul.f32 %v262_v40, %v2746_v57 }
 0x223   :  { %v246_v44 = vmul.f32 0.5, %v245_v41 }
 0x224   :  { %v269_v45 = vmul.f32 %v2380_v39, %v264_v43 }
 0x225   :  { %v247_v46 = vsub.f32 1.5, %v246_v44  ;;  %v2392_v44 = vld [vmem:[%s3531_s13] ss:$0 sm:$0xff] }
 0x226   :  { %v2838_v47 = vadd.f32 %v2381_v42, %v269_v45 }
 0x227   :  { %v248_v49 = vmul.f32 %v2427_v36, %v247_v46 }
 0x228   :  { %2222 = vmatmul.msk.f32.vlgmr.msra.gmra.mxu2 %vm213_vm7, %v2838_v47  ;;  %2226 = vmatmul.msk.f32.vlgmr.msrb.gmra.mxu0 %vm213_vm7, %v2838_v47 }
 0x229   :  { %v252_v51 = vsel %vm251_vm14, %v2427_v36, %v248_v49  ;;  %501 = vmatpush.msra.mxu2 %v412_v48  ;;  %v2391_v36 = vld [vmem:[%s3580_s7 + $0x1] ss:$0 sm:$0xff]  ;;  %v2393_v48 = vld [vmem:[%s3531_s13 + $0x3] ss:$0 sm:$0xff] }
 0x22a   :  { %v263_v52 = vmul.f32 %v252_v51, %v2752_v62  ;;  %v292_v62 = vld [vmem:[%s3575_s30 + $0x68] sm:$0xff] }
 0x22b   :  { %502 = vmatpush.msra.mxu2 %v411_v50 }
 0x22c   :  { %v268_v55 = vmul.f32 %v2380_v39, %v263_v52  ;;  %v2387_v39 = vld [vmem:[%s3581_s4 + $0x1] ss:$0 sm:$0xff]  ;;  %v2986_v52 = vld [vmem:[%s3582_s9 + $0x10] sm:$0xff] }
 0x22d   :  { %503 = vmatpush.msra.mxu2 %v410_v53 }
 0x22e   :  { %v2857_v57 = vadd.f32 %v2381_v42, %v268_v55 }
 0x22f   :  { %504 = vmatpush.msra.mxu2 %v409_v56 }
 0x230   :  { %2220 = vmatmul.msk.f32.vlgmr.msra.gmra.mxu3 %vm213_vm7, %v2857_v57  ;;  %2224 = vmatmul.msk.f32.vlgmr.msrb.gmra.mxu2 %vm213_vm7, %v2857_v57 }
 0x231   :  { %2229 = vmatmul.msk.f32.vlgmr.msra.gmra.mxu0 %vm213_vm7, %v2857_v57  ;;  %389 = vmatpush.msra.mxu3 %v294_v58 }
 0x232   :  { %593 = vmatpush.msrb.mxu2 %v520_v59 }
 0x233   :  { %390 = vmatpush.msra.mxu3 %v293_v60  ;;  %v2993_v60 = vld [vmem:[%s3582_s9] sm:$0xff] }
 0x234   :  { %594 = vmatpush.msrb.mxu2 %v519_v61 }
 0x235   :  { %391 = vmatpush.msra.mxu3 %v292_v62 }
 0x236   :  { %595 = vmatpush.msrb.mxu2 %v518_v63 }
 0x237   :  { %392 = vmatpush.msra.mxu3 %v291_v0  ;;  %v3000_v0 = vld [vmem:[%s3582_s9 + $0x18] sm:$0xff] }
 0x238   :  { %2221 = vmatmul.msk.f32.vlgmr.msrb.gmra.mxu3 %vm213_vm7, %v2857_v57  ;;  %2227 = vmatmul.msk.f32.vlgmr.msra.gmra.mxu2 %vm213_vm7, %v2838_v47 }
 0x239   :  { %596 = vmatpush.msrb.mxu2 %v517_v1  ;;  %461 = vmatpush.msrb.mxu3 %v404_v2 }
 0x23b   :  { %462 = vmatpush.msrb.mxu3 %v403_v3 }
 0x23d   :  { %463 = vmatpush.msrb.mxu3 %v402_v4 }
 0x23f   :  { %464 = vmatpush.msrb.mxu3 %v401_v5 }
 0x240   :  { %2223 = vmatmul.msk.f32.vlgmr.msra.gmra.mxu3 %vm213_vm7, %v2838_v47  ;;  %2230 = vmatmul.msk.f32.vlgmr.msrb.gmra.mxu2 %vm213_vm7, %v2838_v47 }
 0x241   :  { %553 = vmatpush.msra.mxu3 %v512_v6  ;;  %v3007_v6 = vld [vmem:[%s3582_s9 + $0x8] sm:$0xff] }
 0x243   :  { %554 = vmatpush.msra.mxu3 %v511_v7 }
 0x245   :  { %555 = vmatpush.msra.mxu3 %v510_v8 }
 0x247   :  { %556 = vmatpush.msra.mxu3 %v509_v9 }
 0x248   :  { %2225 = vmatmul.msk.f32.vlgmr.msrb.gmra.mxu3 %vm213_vm7, %v2857_v57 }
 0x249   :  { %613 = vmatpush.msrb.mxu3 %v524_v10 }
 0x24b   :  { %614 = vmatpush.msrb.mxu3 %v523_v11 }
 0x24d   :  { %615 = vmatpush.msrb.mxu3 %v522_v12 }
 0x24f   :  { %616 = vmatpush.msrb.mxu3 %v521_v13 }
 0x250   :  { %2228 = vmatmul.msk.f32.vlgmr.msra.gmra.mxu3 %vm213_vm7, %v2857_v57 }
 0x258   :  { %2231 = vmatmul.msk.f32.vlgmr.msrb.gmra.mxu3 %vm213_vm7, %v2838_v47 }
 0x2a5   :  { %v486_v15 = vpop.f32.mrf.mxu0 }
 0x2a6   :  { %v487_v16 = vadd.f32 %v2382_v14, %v486_v15 }
 0x2a8   :  { %2236 = vmatpush.xpose.msk.msra.mxu2 %vm621_vm15, %v487_v16 }
 0x2ab   :  { %v374_v18 = vpop.f32.mrf.mxu2 }
 0x2ac   :  { %v375_v19 = vadd.f32 %v2383_v17, %v374_v18 }
 0x2ae   :  { %2237 = vmatmul.msk.f32.vlgmr.msra.gmra.mxu2 %vm621_vm15, %v375_v19  ;;  %v578_v38 = vpop.f32.mrf.mxu0 }
 0x2af   :  { %v579_v42 = vadd.f32 %v2384_v37, %v578_v38 }
 0x2b3   :  { %v331_v22 = vpop.f32.mrf.mxu3  ;;  %v446_v23 = vpop.f32.mrf.mxu2 }
 0x2b4   :  { %v447_v24 = vadd.f32 %v2386_v20, %v446_v23  ;;  %v332_v25 = vadd.f32 %v2385_v21, %v331_v22 }
 0x2b6   :  { %2232 = vmatpush.xpose.msk.msrb.mxu1 %vm621_vm15, %v447_v24 }
 0x2b9   :  { %2233 = vmatmul.msk.f32.vlgmr.msrb.gmra.mxu1 %vm621_vm15, %v332_v25 }
 0x2bb   :  { %v351_v27 = vpop.f32.mrf.mxu3  ;;  %v506_v28 = vpop.f32.mrf.mxu2 }
 0x2bc   :  { %v507_v29 = vadd.f32 %v2388_v26, %v506_v28  ;;  %v352_v43 = vadd.f32 %v2387_v39, %v351_v27 }
 0x2be   :  { %2238 = vmatpush.xpose.msk.msra.mxu3 %vm621_vm15, %v507_v29 }
 0x2c3   :  { %v394_v32 = vpop.f32.mrf.mxu3  ;;  %v598_v33 = vpop.f32.mrf.mxu2 }
 0x2c4   :  { %v395_v34 = vadd.f32 %v2389_v30, %v394_v32  ;;  %v599_v35 = vadd.f32 %v2390_v31, %v598_v33  ;;  %v876_v33 = vld [vmem:[%s3532_s14 + $0x28] sm:$0xff] }
 0x2c6   :  { %2239 = vmatmul.msk.f32.vlgmr.msra.gmra.mxu3 %vm621_vm15, %v395_v34  ;;  %843 = vmatpush.msrb.mxu2 %v599_v35 }
 0x2c8   :  { %942 = vmatpush.msra.mxu2 %v876_v33 }
 0x2cb   :  { %v466_v40 = vpop.f32.mrf.mxu3 }
 0x2cc   :  { %v467_v41 = vadd.f32 %v2391_v36, %v466_v40 }
 0x2ce   :  { %2234 = vmatpush.xpose.msk.msrb.mxu0 %vm621_vm15, %v467_v41 }
 0x2d1   :  { %2235 = vmatmul.msk.f32.vlgmr.msrb.gmra.mxu0 %vm621_vm15, %v352_v43  ;;  %v875_v43 = vld [vmem:[%s3532_s14 + $0x20] sm:$0xff] }
 0x2d2   :  { %820 = vmatpush.msra.mxu0 %v579_v42  ;;  %v872_v42 = vld [vmem:[%s3532_s14 + $0x8] sm:$0xff]  ;;  %943 = vmatpush.msra.mxu2 %v875_v43 }
 0x2d3   :  { %v558_v45 = vpop.f32.mrf.mxu3 }
 0x2d4   :  { %v559_v46 = vadd.f32 %v2392_v44, %v558_v45  ;;  %v871_v44 = vld [vmem:[%s3532_s14] sm:$0xff]  ;;  %v878_v45 = vld [vmem:[%s3532_s14 + $0x38] sm:$0xff] }
 0x2d6   :  { %797 = vmatpush.msra.mxu1 %v559_v46  ;;  %v874_v46 = vld [vmem:[%s3532_s14 + $0x18] sm:$0xff] }
 0x2d7   :  { %919 = vmatpush.msrb.mxu0 %v874_v46 }
 0x2d8   :  { %896 = vmatpush.msrb.mxu1 %v872_v42 }
 0x2da   :  { %897 = vmatpush.msrb.mxu1 %v871_v44 }
 0x2db   :  { %v618_v49 = vpop.f32.mrf.mxu3 }
 0x2dc   :  { %v619_v50 = vadd.f32 %v2393_v48, %v618_v49  ;;  %v877_v48 = vld [vmem:[%s3532_s14 + $0x30] sm:$0xff] }
 0x2dd   :  { %v873_v49 = vld [vmem:[%s3532_s14 + $0x10] sm:$0xff] }
 0x2de   :  { %866 = vmatpush.msrb.mxu3 %v619_v50  ;;  %920 = vmatpush.msrb.mxu0 %v873_v49 }
 0x2e0   :  { %965 = vmatpush.msra.mxu3 %v878_v45  ;;  %v2396_v45 = vld [vmem:[%s3535_s17] ss:$0 sm:$0xff] }
 0x2e2   :  { %966 = vmatpush.msra.mxu3 %v877_v48 }
 0x331   :  { %v697_v51 = vpop.f32.mrf.mxu2 }
 0x332   :  { %v728_v53 = vmul.f32 0.25, %v697_v51 }
 0x334   :  { %v732_v55 = vadd.f32 %v728_v53, %v2986_v52 }
 0x336   :  { %v645_v56 = vpop.f32.mrf.mxu1  ;;  %v741_v58 = vsel %vm734_vm0, %v732_v55, -inf }
 0x337   :  { %v726_v59 = vmul.f32 0.25, %v645_v56  ;;  %742 = vmax.xlane.f32.xlu2 %v741_v58 }
 0x339   :  { %v730_v61 = vadd.f32 %v726_v59, %v2993_v60  ;;  %v2394_v59 = vld [vmem:[%s3533_s15] ss:$0 sm:$0xff] }
 0x33b   :  { %v735_v62 = vsel %vm734_vm0, %v730_v61, -inf }
 0x33f   :  { %736 = vmax.xlane.f32.xlu2 %v735_v62 }
 0x349   :  { %v723_v63 = vpop.f32.mrf.mxu3 }
 0x34a   :  { %v729_v1 = vmul.f32 0.25, %v723_v63 }
 0x34c   :  { %v733_v2 = vadd.f32 %v729_v1, %v3000_v0 }
 0x34e   :  { %v671_v3 = vpop.f32.mrf.mxu0  ;;  %v744_v4 = vsel %vm734_vm0, %v733_v2, -inf }
 0x34f   :  { %v727_v5 = vmul.f32 0.25, %v671_v3  ;;  %745 = vmax.xlane.f32.xlu2 %v744_v4 }
 0x351   :  { %v731_v7 = vadd.f32 %v727_v5, %v3007_v6 }
 0x353   :  { %v738_v8 = vsel %vm734_vm0, %v731_v7, -inf }
 0x357   :  { %739 = vmax.xlane.f32.xlu2 %v738_v8 }
 0x3aa   :  { %v743_v9 = vpop.xlane.xlu2 %742 }
 0x3ab   :  { %v749_v10 = vsub.f32 %v732_v55, %v743_v9 }
 0x3ad   :  { %v755_v11 = vmul.f32 1.442695, %v749_v10 }
 0x3af   :  { %2428 = vpow2.f32 %v755_v11 }
 0x3b2   :  { %v737_v12 = vpop.xlane.xlu2 %736 }
 0x3b3   :  { %v747_v13 = vsub.f32 %v730_v61, %v737_v12 }
 0x3b5   :  { %v2429_v14 = vpop.eup %2428  ;;  %v751_v15 = vmul.f32 1.442695, %v747_v13 }
 0x3b6   :  { %v765_v16 = vsel %vm734_vm0, %v2429_v14, 0.0 }
 0x3b7   :  { %2430 = vpow2.f32 %v751_v15  ;;  %766 = vadd.xlane.f32.xlu2 %v765_v16 }
 0x3bd   :  { %v2431_v17 = vpop.eup %2430 }
 0x3be   :  { %v759_v18 = vsel %vm734_vm0, %v2431_v17, 0.0 }
 0x3bf   :  { %760 = vadd.xlane.f32.xlu0 %v759_v18 }
 0x3c2   :  { %v746_v19 = vpop.xlane.xlu2 %745 }
 0x3c3   :  { %v750_v20 = vsub.f32 %v733_v2, %v746_v19 }
 0x3c5   :  { %v757_v21 = vmul.f32 1.442695, %v750_v20 }
 0x3c7   :  { %2432 = vpow2.f32 %v757_v21 }
 0x3ca   :  { %v740_v22 = vpop.xlane.xlu2 %739 }
 0x3cb   :  { %v748_v23 = vsub.f32 %v731_v7, %v740_v22  ;;  %v1043_v22 = vld [vmem:[%s3536_s18 + $0x10] sm:$0xff] }
 0x3cd   :  { %v2433_v24 = vpop.eup %2432  ;;  %v753_v25 = vmul.f32 1.442695, %v748_v23  ;;  %v1042_v23 = vld [vmem:[%s3536_s18 + $0x8] sm:$0xff] }
 0x3ce   :  { %v768_v26 = vsel %vm734_vm0, %v2433_v24, 0.0 }
 0x3cf   :  { %2434 = vpow2.f32 %v753_v25  ;;  %769 = vadd.xlane.f32.xlu2 %v768_v26 }
 0x3d5   :  { %v2435_v27 = vpop.eup %2434 }
 0x3d6   :  { %v762_v28 = vsel %vm734_vm0, %v2435_v27, 0.0 }
 0x3d7   :  { %763 = vadd.xlane.f32.xlu1 %v762_v28 }
 0x42a   :  { %v767_v29 = vpop.xlane.xlu2 %766 }
 0x42b   :  { %2436 = vrcp.f32 %v767_v29 }
 0x431   :  { %v2437_v30 = vpop.eup %2436 }
 0x432   :  { %v777_v31 = vmul.f32 %v2437_v30, %v2429_v14  ;;  %v761_v32 = vpop.xlane.xlu0 %760 }
 0x433   :  { %2438 = vrcp.f32 %v761_v32 }
 0x434   :  { %2242 = vmatmul.msk.f32.vlgmr.msrb.gmra.mxu2 %vm734_vm0, %v777_v31 }
 0x439   :  { %v2439_v34 = vpop.eup %2438 }
 0x43a   :  { %v775_v35 = vmul.f32 %v2439_v34, %v2431_v17 }
 0x43c   :  { %2240 = vmatmul.msk.f32.vlgmr.msra.gmra.mxu1 %vm734_vm0, %v775_v35 }
 0x442   :  { %v770_v36 = vpop.xlane.xlu2 %769 }
 0x443   :  { %2440 = vrcp.f32 %v770_v36 }
 0x449   :  { %v2441_v37 = vpop.eup %2440 }
 0x44a   :  { %v778_v38 = vmul.f32 %v2441_v37, %v2433_v24  ;;  %v764_v39 = vpop.xlane.xlu1 %763  ;;  %v1041_v24 = vld [vmem:[%s3536_s18] sm:$0xff] }
 0x44b   :  { %2442 = vrcp.f32 %v764_v39 }
 0x44c   :  { %2243 = vmatmul.msk.f32.vlgmr.msrb.gmra.mxu3 %vm734_vm0, %v778_v38 }
 0x451   :  { %v2443_v40 = vpop.eup %2442 }
 0x452   :  { %v776_v41 = vmul.f32 %v2443_v40, %v2435_v27 }
 0x454   :  { %2241 = vmatmul.msk.f32.vlgmr.msra.gmra.mxu0 %vm734_vm0, %v776_v41  ;;  %v2395_v41 = vld [vmem:[%s3534_s16] ss:$0 sm:$0xff] }
 0x4b7   :  { %v845_v50 = vpop.f32.mrf.mxu2 }
 0x4b8   :  { %2246 = vmatmul.msk.f32.vlgmr.msra.gmra.mxu2 %vm621_vm15, %v845_v50 }
 0x4b9   :  { %v799_v51 = vpop.f32.mrf.mxu1 }
 0x4ba   :  { %2244 = vmatmul.msk.f32.vlgmr.msrb.gmra.mxu1 %vm621_vm15, %v799_v51 }
 0x4cf   :  { %v868_v53 = vpop.f32.mrf.mxu3 }
 0x4d0   :  { %2247 = vmatmul.msk.f32.vlgmr.msra.gmra.mxu3 %vm621_vm15, %v868_v53 }
 0x4d1   :  { %v822_v55 = vpop.f32.mrf.mxu0 }
 0x4d2   :  { %2245 = vmatmul.msk.f32.vlgmr.msrb.gmra.mxu0 %vm621_vm15, %v822_v55 }
 0x537   :  { %v899_v56 = vpop.f32.mrf.mxu1 }
 0x538   :  { %v971_v61 = vsel %vm213_vm7, %v899_v56, 0.0  ;;  %v1103_v56 = vld [vmem:[%s3538_s20 + $0x38] sm:$0xff] }
 0x539   :  { %1122 = vmatpush.msra.mxu0 %v1103_v56  ;;  %v2257_v56 = vld [vmem:[%s3575_s30 + $0xa8] sm:$0xff] }
 0x53b   :  { %v945_v63 = vpop.f32.mrf.mxu2 }
 0x53c   :  { %v974_v4 = vsel %vm213_vm7, %v945_v63, 0.0  ;;  %v1098_v63 = vld [vmem:[%s3538_s20 + $0x10] sm:$0xff] }
 0x54f   :  { %v922_v58 = vpop.f32.mrf.mxu0 }
 0x550   :  { %v972_v62 = vsel %vm213_vm7, %v922_v58, 0.0  ;;  %v1102_v58 = vld [vmem:[%s3538_s20 + $0x30] sm:$0xff] }
 0x551   :  { %v973_v1 = vadd.f32 %v972_v62, %v971_v61  ;;  %1123 = vmatpush.msra.mxu0 %v1102_v58  ;;  %v1100_v61 = vld [vmem:[%s3538_s20 + $0x20] sm:$0xff]  ;;  %v1099_v62 = vld [vmem:[%s3538_s20 + $0x18] sm:$0xff]  ;;  %v2277_v58 = vld [vmem:[%s3576_s10 + $0x88] sm:$0xff] }
 0x553   :  { %v981_v2 = vadd.f32 %v2394_v59, %v973_v1  ;;  %v968_v3 = vpop.f32.mrf.mxu3  ;;  %v1097_v1 = vld [vmem:[%s3538_s20 + $0x8] sm:$0xff] }
 0x554   :  { %v975_v5 = vsel %vm213_vm7, %v968_v3, 0.0  ;;  %v2397_v3 = vld [vmem:[%s3537_s19] ss:$0 sm:$0xff] }
 0x555   :  { %v976_v7 = vadd.f32 %v975_v5, %v974_v4  ;;  %v983_v8 = vadd.f32 %v981_v2, %v2857_v57  ;;  %v1096_v2 = vld [vmem:[%s3538_s20] sm:$0xff] }
 0x557   :  { %v982_v9 = vadd.f32 %v2394_v59, %v976_v7  ;;  %v987_v10 = vsel %vm213_vm7, %v983_v8, 0.0  ;;  %v1101_v59 = vld [vmem:[%s3538_s20 + $0x28] sm:$0xff] }
 0x558   :  { %988 = vadd.xlane.f32.xlu2 %v987_v10  ;;  %1124 = vmatpush.msra.mxu0 %v1101_v59  ;;  %v2301_v59 = vld [vmem:[%s3577_s1 + $0x88] sm:$0xff] }
 0x559   :  { %v984_v11 = vadd.f32 %v982_v9, %v2838_v47  ;;  %v1044_v47 = vld [vmem:[%s3536_s18 + $0x18] sm:$0xff] }
 0x55a   :  { %1067 = vmatpush.msra.mxu1 %v1044_v47  ;;  %1125 = vmatpush.msra.mxu0 %v1100_v61  ;;  %v2252_v61 = vld [vmem:[%s3575_s30 + $0x80] sm:$0xff] }
 0x55b   :  { %v990_v12 = vsel %vm213_vm7, %v984_v11, 0.0 }
 0x55c   :  { %991 = vadd.xlane.f32.xlu0 %v990_v12  ;;  %1068 = vmatpush.msra.mxu1 %v1043_v22 }
 0x55d   :  { %1126 = vmatpush.msra.mxu0 %v1099_v62  ;;  %v2256_v62 = vld [vmem:[%s3575_s30 + $0xa0] sm:$0xff] }
 0x55e   :  { %1069 = vmatpush.msra.mxu1 %v1042_v23 }
 0x55f   :  { %1127 = vmatpush.msra.mxu0 %v1098_v63  ;;  %v2276_v63 = vld [vmem:[%s3576_s10 + $0x80] sm:$0xff] }
 0x560   :  { %1070 = vmatpush.msra.mxu1 %v1041_v24 }
 0x561   :  { %1128 = vmatpush.msra.mxu0 %v1097_v1  ;;  %v2300_v1 = vld [vmem:[%s3577_s1 + $0x80] sm:$0xff] }
 0x563   :  { %1129 = vmatpush.msra.mxu0 %v1096_v2  ;;  %v2263_v2 = vld [vmem:[%s3575_s30 + $0xd8] sm:$0xff] }
 0x5cb   :  { %v989_v13 = vpop.xlane.xlu2 %988 }
 0x5cc   :  { %v993_v14 = vmul.f32 %v989_v13, %v2743_v54 }
 0x5ce   :  { %v995_v15 = vsub.f32 %v983_v8, %v993_v14 }
 0x5cf   :  { %v992_v16 = vpop.xlane.xlu0 %991 }
 0x5d0   :  { %v994_v17 = vmul.f32 %v992_v16, %v2743_v54  ;;  %v997_v18 = vmul.f32 %v995_v15, %v995_v15 }
 0x5d2   :  { %v996_v19 = vsub.f32 %v984_v11, %v994_v17  ;;  %v999_v57 = vsel %vm213_vm7, %v997_v18, 0.0 }
 0x5d3   :  { %1000 = vadd.xlane.f32.xlu1 %v999_v57 }
 0x5d4   :  { %v998_v20 = vmul.f32 %v996_v19, %v996_v19 }
 0x5d6   :  { %v1002_v21 = vsel %vm213_vm7, %v998_v20, 0.0 }
 0x5d7   :  { %1003 = vadd.xlane.f32.xlu2 %v1002_v21 }
 0x646   :  { %v1001_v25 = vpop.xlane.xlu1 %1000 }
 0x647   :  { %v1005_v26 = vmul.f32 %v1001_v25, %v2743_v54  ;;  %v2398_v25 = vld [vmem:[%s3539_s21] ss:$0 sm:$0xff] }
 0x649   :  { %v1007_v27 = vadd.f32 1e-05, %v1005_v26 }
 0x64a   :  { %v1004_v28 = vpop.xlane.xlu2 %1003 }
 0x64b   :  { %2444 = vrsqrt.f32 %v1007_v27  ;;  %v1006_v29 = vmul.f32 %v1004_v28, %v2743_v54  ;;  %vm1015_vm2 = vweird.f32 %v1007_v27 }
 0x64d   :  { %v1008_v30 = vadd.f32 1e-05, %v1006_v29 }
 0x64f   :  { %2446 = vrsqrt.f32 %v1008_v30  ;;  %vm1025_vm6 = vweird.f32 %v1008_v30 }
 0x651   :  { %v2445_v31 = vpop.eup %2444 }
 0x652   :  { %v1010_v32 = vmul.f32 %v2445_v31, %v1007_v27  ;;  %vm1016_vm1 = vweird.f32 %v2445_v31 }
 0x653   :  { %vm1017_vm3 = vmor %vm1015_vm2, %vm1016_vm1 }
 0x654   :  { %v1011_v33 = vmul.f32 %v2445_v31, %v1010_v32 }
 0x655   :  { %v2447_v34 = vpop.eup %2446 }
 0x656   :  { %v1012_v35 = vmul.f32 0.5, %v1011_v33  ;;  %v1020_v36 = vmul.f32 %v2447_v34, %v1008_v30  ;;  %vm1026_vm5 = vweird.f32 %v2447_v34 }
 0x657   :  { %vm1027_vm8 = vmor %vm1025_vm6, %vm1026_vm5 }
 0x658   :  { %v1013_v37 = vsub.f32 1.5, %v1012_v35  ;;  %v1021_v38 = vmul.f32 %v2447_v34, %v1020_v36 }
 0x65a   :  { %v1014_v39 = vmul.f32 %v2445_v31, %v1013_v37  ;;  %v1022_v40 = vmul.f32 0.5, %v1021_v38 }
 0x65c   :  { %v1018_v42 = vsel %vm1017_vm3, %v2445_v31, %v1014_v39  ;;  %v1023_v43 = vsub.f32 1.5, %v1022_v40 }
 0x65d   :  { %v1029_v44 = vmul.f32 %v1018_v42, %v995_v15 }
 0x65e   :  { %v1024_v46 = vmul.f32 %v2447_v34, %v1023_v43 }
 0x65f   :  { %v1034_v48 = vmul.f32 %v2395_v41, %v1029_v44  ;;  %v2255_v44 = vld [vmem:[%s3575_s30 + $0x98] sm:$0xff] }
 0x660   :  { %v1028_v49 = vsel %vm1027_vm8, %v2447_v34, %v1024_v46  ;;  %v2279_v46 = vld [vmem:[%s3576_s10 + $0x98] sm:$0xff]  ;;  %1244 = vmatpush.msrb.mxu2 %v2255_v44 }
 0x661   :  { %v1039_v50 = vadd.f32 %v2396_v45, %v1034_v48  ;;  %v1030_v51 = vmul.f32 %v1028_v49, %v996_v19  ;;  %v2303_v48 = vld [vmem:[%s3577_s1 + $0x98] sm:$0xff]  ;;  %1361 = vmatpush.msrb.mxu1 %v2279_v46  ;;  %v2254_v49 = vld [vmem:[%s3575_s30 + $0x90] sm:$0xff]  ;;  %v2281_v46 = vld [vmem:[%s3576_s10 + $0xa8] sm:$0xff] }
 0x662   :  { %1475 = vmatpush.msrb.mxu0 %v2303_v48  ;;  %1245 = vmatpush.msrb.mxu2 %v2254_v49  ;;  %v2285_v48 = vld [vmem:[%s3576_s10 + $0xc8] sm:$0xff] }
 0x663   :  { %2248 = vmatmul.msk.f32.vlgmr.msra.gmra.mxu1 %vm213_vm7, %v1039_v50  ;;  %v1035_v53 = vmul.f32 %v2395_v41, %v1030_v51  ;;  %v2278_v51 = vld [vmem:[%s3576_s10 + $0x90] sm:$0xff] }
 0x664   :  { %1362 = vmatpush.msrb.mxu1 %v2278_v51  ;;  %v2280_v51 = vld [vmem:[%s3576_s10 + $0xa0] sm:$0xff] }
 0x665   :  { %v1040_v55 = vadd.f32 %v2396_v45, %v1035_v53  ;;  %v2259_v45 = vld [vmem:[%s3575_s30 + $0xb8] sm:$0xff]  ;;  %v2302_v53 = vld [vmem:[%s3577_s1 + $0x90] sm:$0xff] }
 0x666   :  { %1264 = vmatpush.msrb.mxu3 %v2259_v45  ;;  %1476 = vmatpush.msrb.mxu0 %v2302_v53  ;;  %v2314_v45 = vld [vmem:[%s3577_s1 + $0xf0] sm:$0xff]  ;;  %v2284_v53 = vld [vmem:[%s3576_s10 + $0xc0] sm:$0xff] }
 0x667   :  { %1363 = vmatpush.msrb.mxu1 %v2277_v58  ;;  %v2311_v58 = vld [vmem:[%s3577_s1 + $0xd8] sm:$0xff] }
 0x668   :  { %1477 = vmatpush.msrb.mxu0 %v2301_v59  ;;  %v2306_v59 = vld [vmem:[%s3577_s1 + $0xb0] sm:$0xff] }
 0x669   :  { %1364 = vmatpush.msrb.mxu1 %v2276_v63  ;;  %v2309_v63 = vld [vmem:[%s3577_s1 + $0xc8] sm:$0xff] }
 0x66a   :  { %1478 = vmatpush.msrb.mxu0 %v2300_v1  ;;  %v2304_v1 = vld [vmem:[%s3577_s1 + $0xa0] sm:$0xff] }
 0x66b   :  { %2249 = vmatmul.msk.f32.gmra.mxu1 %vm213_vm7, %v1040_v55 }
 0x6e0   :  { %v1072_v4 = vpop.f32.mrf.mxu1 }
 0x6e1   :  { %v1073_v5 = vadd.f32 %v2397_v3, %v1072_v4  ;;  %v2291_v4 = vld [vmem:[%s3576_s10 + $0xf8] sm:$0xff] }
 0x6e2   :  { %1421 = vmatpush.msra.mxu1 %v2291_v4  ;;  %v2402_v4 = vld [vmem:[%s3531_s13 + $0x4] ss:$0 sm:$0xff] }
 0x6e3   :  { %v1080_v7 = vmul.f32 0.044715, %v1073_v5  ;;  %v1078_v57 = vmul.f32 0.5, %v1073_v5 }
 0x6e5   :  { %v1082_v8 = vmul.f32 %v1080_v7, %v1073_v5  ;;  %v2262_v7 = vld [vmem:[%s3575_s30 + $0xd0] sm:$0xff] }
 0x6e7   :  { %v1084_v9 = vmul.f32 %v1082_v8, %v1073_v5  ;;  %v2266_v8 = vld [vmem:[%s3575_s30 + $0xf0] sm:$0xff] }
 0x6e8   :  { %v1075_v10 = vpop.f32.mrf.mxu1 }
 0x6e9   :  { %v1086_v11 = vadd.f32 %v1084_v9, %v1073_v5  ;;  %v1076_v12 = vadd.f32 %v2397_v3, %v1075_v10  ;;  %v2267_v3 = vld [vmem:[%s3575_s30 + $0xf8] sm:$0xff]  ;;  %v2290_v9 = vld [vmem:[%s3576_s10 + $0xf0] sm:$0xff] }
 0x6ea   :  { %1422 = vmatpush.msra.mxu1 %v2290_v9 }
 0x6eb   :  { %v1088_v13 = vmul.f32 0.7978846, %v1086_v11  ;;  %v1081_v14 = vmul.f32 0.044715, %v1076_v12  ;;  %v1079_v22 = vmul.f32 0.5, %v1076_v12  ;;  %v2261_v11 = vld [vmem:[%s3575_s30 + $0xc8] sm:$0xff] }
 0x6ed   :  { %2448 = vtanh.f32 %v1088_v13  ;;  %v1083_v15 = vmul.f32 %v1081_v14, %v1076_v12  ;;  %v2289_v13 = vld [vmem:[%s3576_s10 + $0xe8] sm:$0xff] }
 0x6ee   :  { %1423 = vmatpush.msra.mxu1 %v2289_v13  ;;  %v2405_v13 = vld [vmem:[%s3580_s7 + $0x7] ss:$0 sm:$0xff] }
 0x6ef   :  { %v1085_v16 = vmul.f32 %v1083_v15, %v1076_v12  ;;  %v2260_v15 = vld [vmem:[%s3575_s30 + $0xc0] sm:$0xff] }
 0x6f1   :  { %v1087_v17 = vadd.f32 %v1085_v16, %v1076_v12  ;;  %v2265_v12 = vld [vmem:[%s3575_s30 + $0xe8] sm:$0xff]  ;;  %v2264_v16 = vld [vmem:[%s3575_s30 + $0xe0] sm:$0xff] }
 0x6f3   :  { %v2449_v18 = vpop.eup %2448  ;;  %v1089_v19 = vmul.f32 0.7978846, %v1087_v17  ;;  %v2288_v17 = vld [vmem:[%s3576_s10 + $0xe0] sm:$0xff] }
 0x6f4   :  { %v1092_v20 = vadd.f32 1.0, %v2449_v18  ;;  %1424 = vmatpush.msra.mxu1 %v2288_v17  ;;  %v2407_v17 = vld [vmem:[%s3581_s4 + $0x7] ss:$0 sm:$0xff] }
 0x6f5   :  { %2450 = vtanh.f32 %v1089_v19 }
 0x6f6   :  { %v1094_v21 = vmul.f32 %v1092_v20, %v1078_v57 }
 0x6f8   :  { %2250 = vmatmul.msk.f32.vlgmr.msra.gmra.mxu0 %vm141_vm4, %v1094_v21 }
 0x6fb   :  { %v2451_v47 = vpop.eup %2450 }
 0x6fc   :  { %v1093_v23 = vadd.f32 1.0, %v2451_v47 }
 0x6fe   :  { %v1095_v24 = vmul.f32 %v1093_v23, %v1079_v22 }
 0x700   :  { %2251 = vmatmul.msk.f32.gmra.mxu0 %vm141_vm4, %v1095_v24 }
 0x775   :  { %v1131_v26 = vpop.f32.mrf.mxu0 }
 0x776   :  { %v1132_v27 = vadd.f32 %v2398_v25, %v1131_v26 }
 0x778   :  { %v1137_v28 = vadd.f32 %v1132_v27, %v1039_v50  ;;  %v2258_v50 = vld [vmem:[%s3575_s30 + $0xb0] sm:$0xff]  ;;  %v2399_v27 = vld [vmem:[%s3540_s22] ss:$0 sm:$0xff] }
 0x779   :  { %1265 = vmatpush.msrb.mxu3 %v2258_v50 }
 0x77a   :  { %v1141_v29 = vsel %vm213_vm7, %v1137_v28, 0.0 }
 0x77b   :  { %1142 = vadd.xlane.f32.xlu0 %v1141_v29  ;;  %1266 = vmatpush.msrb.mxu3 %v2257_v56  ;;  %v2307_v56 = vld [vmem:[%s3577_s1 + $0xb8] sm:$0xff] }
 0x77d   :  { %v1134_v30 = vpop.f32.mrf.mxu0  ;;  %1267 = vmatpush.msrb.mxu3 %v2256_v62  ;;  %v2305_v62 = vld [vmem:[%s3577_s1 + $0xa8] sm:$0xff] }
 0x77e   :  { %v1135_v31 = vadd.f32 %v2398_v25, %v1134_v30  ;;  %v2400_v30 = vld [vmem:[%s3541_s23] ss:$0 sm:$0xff] }
 0x77f   :  { %1307 = vmatpush.msra.mxu3 %v2267_v3  ;;  %v2401_v3 = vld [vmem:[%s3580_s7 + $0x4] ss:$0 sm:$0xff] }
 0x780   :  { %v1138_v32 = vadd.f32 %v1135_v31, %v1040_v55  ;;  %v2253_v55 = vld [vmem:[%s3575_s30 + $0x88] sm:$0xff] }
 0x781   :  { %1246 = vmatpush.msrb.mxu2 %v2253_v55  ;;  %1308 = vmatpush.msra.mxu3 %v2266_v8  ;;  %v2312_v55 = vld [vmem:[%s3577_s1 + $0xe0] sm:$0xff] }
 0x782   :  { %v1144_v33 = vsel %vm213_vm7, %v1138_v32, 0.0 }
 0x783   :  { %1145 = vadd.xlane.f32.xlu1 %v1144_v33  ;;  %1247 = vmatpush.msrb.mxu2 %v2252_v61  ;;  %v2310_v61 = vld [vmem:[%s3577_s1 + $0xd0] sm:$0xff] }
 0x784   :  { %1309 = vmatpush.msra.mxu3 %v2265_v12 }
 0x785   :  { %1287 = vmatpush.msra.mxu2 %v2263_v2  ;;  %v2308_v2 = vld [vmem:[%s3577_s1 + $0xc0] sm:$0xff] }
 0x786   :  { %1310 = vmatpush.msra.mxu3 %v2264_v16 }
 0x787   :  { %1288 = vmatpush.msra.mxu2 %v2262_v7 }
 0x789   :  { %1289 = vmatpush.msra.mxu2 %v2261_v11 }
 0x78b   :  { %1290 = vmatpush.msra.mxu2 %v2260_v15 }
 0x7ee   :  { %v1143_v34 = vpop.xlane.xlu0 %1142 }
 0x7ef   :  { %v1147_v35 = vmul.f32 %v1143_v34, %v2743_v54 }
 0x7f1   :  { %v3119_v36 = vsub.f32 %v1137_v28, %v1147_v35 }
 0x7f3   :  { %v1151_v37 = vmul.f32 %v3119_v36, %v3119_v36 }
 0x7f5   :  { %v1153_v38 = vsel %vm213_vm7, %v1151_v37, 0.0 }
 0x7f6   :  { %1154 = vadd.xlane.f32.xlu2 %v1153_v38  ;;  %v1146_v39 = vpop.xlane.xlu1 %1145  ;;  %v2283_v38 = vld [vmem:[%s3576_s10 + $0xb8] sm:$0xff] }
 0x7f7   :  { %v1148_v40 = vmul.f32 %v1146_v39, %v2743_v54  ;;  %v2287_v39 = vld [vmem:[%s3576_s10 + $0xd8] sm:$0xff] }
 0x7f9   :  { %v3125_v41 = vsub.f32 %v1138_v32, %v1148_v40 }
 0x7fb   :  { %v1152_v42 = vmul.f32 %v3125_v41, %v3125_v41 }
 0x7fd   :  { %v1156_v43 = vsel %vm213_vm7, %v1152_v42, 0.0  ;;  %v2282_v42 = vld [vmem:[%s3576_s10 + $0xb0] sm:$0xff] }
 0x7fe   :  { %1157 = vadd.xlane.f32.xlu0 %v1156_v43  ;;  %v2286_v43 = vld [vmem:[%s3576_s10 + $0xd0] sm:$0xff] }
 0x869   :  { %v1155_v5 = vpop.xlane.xlu2 %1154 }
 0x86a   :  { %v1159_v10 = vmul.f32 %v1155_v5, %v2743_v54 }
 0x86c   :  { %v1161_v14 = vadd.f32 1e-05, %v1159_v10  ;;  %v2403_v10 = vld [vmem:[%s3581_s4 + $0x4] ss:$0 sm:$0xff] }
 0x86e   :  { %2452 = vrsqrt.f32 %v1161_v14  ;;  %vm1169_vm10 = vweird.f32 %v1161_v14 }
 0x871   :  { %v1158_v18 = vpop.xlane.xlu0 %1157 }
 0x872   :  { %v1160_v19 = vmul.f32 %v1158_v18, %v2743_v54 }
 0x874   :  { %v2453_v57 = vpop.eup %2452  ;;  %v1162_v20 = vadd.f32 1e-05, %v1160_v19 }
 0x875   :  { %v1164_v21 = vmul.f32 %v2453_v57, %v1161_v14  ;;  %vm1170_vm9 = vweird.f32 %v2453_v57 }
 0x876   :  { %2454 = vrsqrt.f32 %v1162_v20  ;;  %vm1171_vm11 = vmor %vm1169_vm10, %vm1170_vm9  ;;  %vm1179_vm13 = vweird.f32 %v1162_v20 }
 0x877   :  { %v1165_v47 = vmul.f32 %v2453_v57, %v1164_v21 }
 0x879   :  { %v1166_v22 = vmul.f32 0.5, %v1165_v47 }
 0x87b   :  { %v1167_v23 = vsub.f32 1.5, %v1166_v22  ;;  %v2409_v22 = vld [vmem:[%s3580_s7 + $0x5] ss:$0 sm:$0xff] }
 0x87c   :  { %v2455_v24 = vpop.eup %2454 }
 0x87d   :  { %v1168_v25 = vmul.f32 %v2453_v57, %v1167_v23  ;;  %v1174_v26 = vmul.f32 %v2455_v24, %v1162_v20  ;;  %vm1180_vm12 = vweird.f32 %v2455_v24  ;;  %v2410_v23 = vld [vmem:[%s3580_s7 + $0x6] ss:$0 sm:$0xff] }
 0x87e   :  { %vm1181_vm14 = vmor %vm1179_vm13, %vm1180_vm12  ;;  %vm2128_vm12 = vcmask 1040384   ;;  %vm2193_vm13 = vcmask 9216  }
 0x87f   :  { %v1172_v28 = vsel %vm1171_vm11, %v2453_v57, %v1168_v25  ;;  %v1175_v29 = vmul.f32 %v2455_v24, %v1174_v26  ;;  %v2408_v57 = vld [vmem:[%s3531_s13 + $0x7] ss:$0 sm:$0xff]  ;;  %v2406_v25 = vld [vmem:[%s3581_s4 + $0x6] ss:$0 sm:$0xff] }
 0x880   :  { %v1183_v31 = vmul.f32 %v1172_v28, %v3119_v36  ;;  %v2315_v36 = vld [vmem:[%s3577_s1 + $0xf8] sm:$0xff] }
 0x881   :  { %v1176_v32 = vmul.f32 0.5, %v1175_v29 }
 0x882   :  { %v1188_v33 = vmul.f32 %v2399_v27, %v1183_v31 }
 0x883   :  { %v1177_v34 = vsub.f32 1.5, %v1176_v32  ;;  %v2411_v32 = vld [vmem:[%s3531_s13 + $0x5] ss:$0 sm:$0xff] }
 0x884   :  { %v3223_v35 = vadd.f32 %v2400_v30, %v1188_v33  ;;  %v2412_v33 = vld [vmem:[%s3531_s13 + $0x6] ss:$0 sm:$0xff] }
 0x885   :  { %v1178_v37 = vmul.f32 %v2455_v24, %v1177_v34 }
 0x886   :  { %2272 = vmatmul.msk.f32.vlgmr.msrb.gmra.mxu2 %vm213_vm7, %v3223_v35  ;;  %2273 = vmatmul.msk.f32.vlgmr.msrb.gmra.mxu3 %vm213_vm7, %v3223_v35 }
 0x887   :  { %v1182_v40 = vsel %vm1181_vm14, %v2455_v24, %v1178_v37  ;;  %2296 = vmatmul.msk.f32.vlgmr.msrb.gmra.mxu1 %vm213_vm7, %v3223_v35  ;;  %2320 = vmatmul.msk.f32.vlgmr.msrb.gmra.mxu0 %vm213_vm7, %v3223_v35  ;;  %v2404_v24 = vld [vmem:[%s3581_s4 + $0x5] ss:$0 sm:$0xff] }
 0x888   :  { %v1184_v44 = vmul.f32 %v1182_v40, %v3125_v41  ;;  %1381 = vmatpush.msrb.mxu2 %v2283_v38  ;;  %1401 = vmatpush.msrb.mxu3 %v2287_v39  ;;  %v2313_v41 = vld [vmem:[%s3577_s1 + $0xe8] sm:$0xff] }
 0x889   :  { %1535 = vmatpush.msrb.mxu1 %v2315_v36 }
 0x88a   :  { %v1189_v49 = vmul.f32 %v2399_v27, %v1184_v44  ;;  %1382 = vmatpush.msrb.mxu2 %v2282_v42  ;;  %1402 = vmatpush.msrb.mxu3 %v2286_v43 }
 0x88b   :  { %1536 = vmatpush.msrb.mxu1 %v2314_v45 }
 0x88c   :  { %v3261_v50 = vadd.f32 %v2400_v30, %v1189_v49  ;;  %1383 = vmatpush.msrb.mxu2 %v2281_v46  ;;  %1403 = vmatpush.msrb.mxu3 %v2285_v48 }
 0x88d   :  { %1537 = vmatpush.msrb.mxu1 %v2313_v41 }
 0x88e   :  { %2274 = vmatmul.msk.f32.vlgmr.msra.gmra.mxu2 %vm213_vm7, %v3261_v50  ;;  %2275 = vmatmul.msk.f32.vlgmr.msra.gmra.mxu3 %vm213_vm7, %v3261_v50 }
 0x88f   :  { %2299 = vmatmul.msk.f32.vlgmr.msra.gmra.mxu1 %vm213_vm7, %v3261_v50  ;;  %1384 = vmatpush.msrb.mxu2 %v2280_v51 }
 0x890   :  { %1404 = vmatpush.msrb.mxu3 %v2284_v53  ;;  %1538 = vmatpush.msrb.mxu1 %v2312_v55 }
 0x891   :  { %1495 = vmatpush.msra.mxu2 %v2307_v56 }
 0x892   :  { %1515 = vmatpush.msra.mxu3 %v2311_v58 }
 0x893   :  { %1496 = vmatpush.msra.mxu2 %v2306_v59 }
 0x894   :  { %1516 = vmatpush.msra.mxu3 %v2310_v61 }
 0x895   :  { %1497 = vmatpush.msra.mxu2 %v2305_v62 }
 0x896   :  { %1517 = vmatpush.msra.mxu3 %v2309_v63  ;;  %2297 = vmatmul.msk.f32.vlgmr.msrb.gmra.mxu2 %vm213_vm7, %v3223_v35 }
 0x897   :  { %2298 = vmatmul.msk.f32.vlgmr.msrb.gmra.mxu3 %vm213_vm7, %v3261_v50  ;;  %2323 = vmatmul.msk.f32.vlgmr.msrb.gmra.mxu1 %vm213_vm7, %v3261_v50 }
 0x898   :  { %1498 = vmatpush.msra.mxu2 %v2304_v1  ;;  %1518 = vmatpush.msra.mxu3 %v2308_v2 }
 0x89e   :  { %2321 = vmatmul.msk.f32.vlgmr.msra.gmra.mxu2 %vm213_vm7, %v3223_v35 }
 0x89f   :  { %2322 = vmatmul.msk.f32.vlgmr.msra.gmra.mxu3 %vm213_vm7, %v3261_v50 }
 0x904   :  { %v1366_v5 = vpop.f32.mrf.mxu1  ;;  %v1480_v7 = vpop.f32.mrf.mxu0 }
 0x905   :  { %v1367_v8 = vadd.f32 %v2401_v3, %v1366_v5  ;;  %v1481_v9 = vadd.f32 %v2402_v4, %v1480_v7 }
 0x907   :  { %2324 = vmatpush.xpose.msk.msra.mxu0 %vm621_vm15, %v1367_v8 }
 0x909   :  { %v1249_v11 = vpop.f32.mrf.mxu2  ;;  %v1269_v12 = vpop.f32.mrf.mxu3 }
 0x90a   :  { %v1250_v14 = vadd.f32 %v2403_v10, %v1249_v11  ;;  %v1270_v30 = vadd.f32 %v2404_v24, %v1269_v12 }
 0x90b   :  { %1717 = vmatpush.msrb.mxu0 %v1481_v9 }
 0x90c   :  { %v1426_v15 = vpop.f32.mrf.mxu1  ;;  %2325 = vmatmul.msk.f32.vlgmr.msra.gmra.mxu0 %vm621_vm15, %v1250_v14 }
 0x90d   :  { %v1427_v16 = vadd.f32 %v2405_v13, %v1426_v15 }
 0x90f   :  { %2330 = vmatpush.xpose.msk.msra.mxu1 %vm621_vm15, %v1427_v16 }
 0x911   :  { %v1292_v18 = vpop.f32.mrf.mxu2  ;;  %v1312_v19 = vpop.f32.mrf.mxu3 }
 0x912   :  { %v1313_v20 = vadd.f32 %v2407_v17, %v1312_v19  ;;  %v1293_v31 = vadd.f32 %v2406_v25, %v1292_v18  ;;  %v2337_v18 = vld [vmem:[%s3532_s14 + $0x48] sm:$0xff] }
 0x913   :  { %1817 = vmatpush.msra.mxu0 %v2337_v18 }
 0x914   :  { %v1540_v21 = vpop.f32.mrf.mxu1  ;;  %2331 = vmatmul.msk.f32.vlgmr.msra.gmra.mxu1 %vm621_vm15, %v1313_v20 }
 0x915   :  { %v1541_v47 = vadd.f32 %v2408_v57, %v1540_v21 }
 0x917   :  { %1786 = vmatpush.msrb.mxu1 %v1541_v47 }
 0x919   :  { %v1386_v26 = vpop.f32.mrf.mxu2 }
 0x91a   :  { %v1406_v27 = vpop.f32.mrf.mxu3  ;;  %v1387_v28 = vadd.f32 %v2409_v22, %v1386_v26  ;;  %v2336_v26 = vld [vmem:[%s3532_s14 + $0x40] sm:$0xff] }
 0x91b   :  { %v1407_v29 = vadd.f32 %v2410_v23, %v1406_v27  ;;  %1818 = vmatpush.msra.mxu0 %v2336_v26  ;;  %v2339_v27 = vld [vmem:[%s3532_s14 + $0x58] sm:$0xff]  ;;  %v2415_v26 = vld [vmem:[%s3535_s17 + $0x1] ss:$0 sm:$0xff] }
 0x91c   :  { %2326 = vmatpush.xpose.msk.msrb.mxu2 %vm621_vm15, %v1387_v28  ;;  %v2341_v28 = vld [vmem:[%s3532_s14 + $0x68] sm:$0xff] }
 0x91d   :  { %2328 = vmatpush.xpose.msk.msrb.mxu3 %vm621_vm15, %v1407_v29  ;;  %v2338_v29 = vld [vmem:[%s3532_s14 + $0x50] sm:$0xff] }
 0x91f   :  { %2327 = vmatmul.msk.f32.vlgmr.msrb.gmra.mxu2 %vm621_vm15, %v1270_v30  ;;  %v2340_v30 = vld [vmem:[%s3532_s14 + $0x60] sm:$0xff] }
 0x920   :  { %2329 = vmatmul.msk.f32.vlgmr.msrb.gmra.mxu3 %vm621_vm15, %v1293_v31  ;;  %v2343_v31 = vld [vmem:[%s3532_s14 + $0x78] sm:$0xff] }
 0x921   :  { %v1500_v34 = vpop.f32.mrf.mxu2  ;;  %1886 = vmatpush.msra.mxu1 %v2343_v31 }
 0x922   :  { %v1520_v37 = vpop.f32.mrf.mxu3  ;;  %v1501_v38 = vadd.f32 %v2411_v32, %v1500_v34 }
 0x923   :  { %v1521_v39 = vadd.f32 %v2412_v33, %v1520_v37  ;;  %v2342_v33 = vld [vmem:[%s3532_s14 + $0x70] sm:$0xff] }
 0x924   :  { %1740 = vmatpush.msra.mxu2 %v1501_v38  ;;  %1887 = vmatpush.msra.mxu1 %v2342_v33  ;;  %v2365_v33 = vld [vmem:[%s3538_s20 + $0x78] sm:$0xff] }
 0x925   :  { %1763 = vmatpush.msra.mxu3 %v1521_v39 }
 0x926   :  { %1840 = vmatpush.msrb.mxu2 %v2339_v27 }
 0x927   :  { %1863 = vmatpush.msrb.mxu3 %v2341_v28 }
 0x928   :  { %1841 = vmatpush.msrb.mxu2 %v2338_v29 }
 0x929   :  { %1864 = vmatpush.msrb.mxu3 %v2340_v30 }
 0x989   :  { %v1566_v36 = vpop.f32.mrf.mxu0 }
 0x98a   :  { %v1647_v40 = vmul.f32 0.25, %v1566_v36 }
 0x98c   :  { %v1651_v42 = vadd.f32 %v1647_v40, %v2993_v60 }
 0x98e   :  { %v1655_v43 = vsel %vm734_vm0, %v1651_v42, -inf }
 0x98f   :  { %1656 = vmax.xlane.f32.xlu0 %v1655_v43 }
 0x991   :  { %v1644_v49 = vpop.f32.mrf.mxu1 }
 0x992   :  { %v1650_v53 = vmul.f32 0.25, %v1644_v49 }
 0x994   :  { %v1654_v60 = vadd.f32 %v1650_v53, %v3000_v0 }
 0x996   :  { %v1664_v58 = vsel %vm734_vm0, %v1654_v60, -inf }
 0x9a2   :  { %v1592_v44 = vpop.f32.mrf.mxu2 }
 0x9a3   :  { %v1618_v45 = vpop.f32.mrf.mxu3  ;;  %v1648_v46 = vmul.f32 0.25, %v1592_v44 }
 0x9a4   :  { %v1649_v48 = vmul.f32 0.25, %v1618_v45 }
 0x9a5   :  { %v1652_v41 = vadd.f32 %v1648_v46, %v3007_v6 }
 0x9a6   :  { %v1653_v51 = vadd.f32 %v1649_v48, %v2986_v52 }
 0x9a7   :  { %v1658_v55 = vsel %vm734_vm0, %v1652_v41, -inf }
 0x9a8   :  { %v1661_v56 = vsel %vm734_vm0, %v1653_v51, -inf  ;;  %1659 = vmax.xlane.f32.xlu1 %v1658_v55 }
 0x9a9   :  { %1662 = vmax.xlane.f32.xlu2 %v1661_v56 }
 0x9b0   :  { %1665 = vmax.xlane.f32.xlu1 %v1664_v58 }
 0xa02   :  { %v1657_v59 = vpop.xlane.xlu0 %1656 }
 0xa03   :  { %v1667_v61 = vsub.f32 %v1651_v42, %v1657_v59  ;;  %v2413_v42 = vld [vmem:[%s3533_s15 + $0x1] ss:$0 sm:$0xff] }
 0xa05   :  { %v1671_v62 = vmul.f32 1.442695, %v1667_v61 }
 0xa07   :  { %2456 = vpow2.f32 %v1671_v62 }
 0xa0d   :  { %v2457_v63 = vpop.eup %2456 }
 0xa0e   :  { %v1679_v6 = vsel %vm734_vm0, %v2457_v63, 0.0 }
 0xa0f   :  { %1680 = vadd.xlane.f32.xlu1 %v1679_v6 }
 0xa1b   :  { %v1660_v52 = vpop.xlane.xlu1 %1659 }
 0xa1c   :  { %v1663_v1 = vpop.xlane.xlu2 %1662  ;;  %v1668_v2 = vsub.f32 %v1652_v41, %v1660_v52 }
 0xa1d   :  { %v1669_v3 = vsub.f32 %v1653_v51, %v1663_v1 }
 0xa1e   :  { %v1673_v4 = vmul.f32 1.442695, %v1668_v2 }
 0xa1f   :  { %v1675_v5 = vmul.f32 1.442695, %v1669_v3  ;;  %v2354_v3 = vld [vmem:[%s3536_s18 + $0x38] sm:$0xff] }
 0xa20   :  { %2458 = vpow2.f32 %v1673_v4  ;;  %v2353_v4 = vld [vmem:[%s3536_s18 + $0x30] sm:$0xff] }
 0xa21   :  { %2460 = vpow2.f32 %v1675_v5  ;;  %v2352_v5 = vld [vmem:[%s3536_s18 + $0x28] sm:$0xff] }
 0xa23   :  { %v1666_v0 = vpop.xlane.xlu1 %1665 }
 0xa24   :  { %v1670_v7 = vsub.f32 %v1654_v60, %v1666_v0  ;;  %v2351_v0 = vld [vmem:[%s3536_s18 + $0x20] sm:$0xff]  ;;  %s2515_s18 = smov [#allocation2]  }
 0xa26   :  { %v2459_v8 = vpop.eup %2458  ;;  %v1677_v9 = vmul.f32 1.442695, %v1670_v7 }
 0xa27   :  { %v2461_v10 = vpop.eup %2460  ;;  %v1682_v11 = vsel %vm734_vm0, %v2459_v8, 0.0 }
 0xa28   :  { %2462 = vpow2.f32 %v1677_v9  ;;  %1683 = vadd.xlane.f32.xlu2 %v1682_v11  ;;  %v1685_v12 = vsel %vm734_vm0, %v2461_v10, 0.0 }
 0xa29   :  { %1686 = vadd.xlane.f32.xlu0 %v1685_v12 }
 0xa2e   :  { %v2463_v13 = vpop.eup %2462 }
 0xa2f   :  { %v1688_v14 = vsel %vm734_vm0, %v2463_v13, 0.0 }
 0xa30   :  { %1689 = vadd.xlane.f32.xlu2 %v1688_v14 }
 0xa82   :  { %v1681_v15 = vpop.xlane.xlu1 %1680 }
 0xa83   :  { %2464 = vrcp.f32 %v1681_v15 }
 0xa89   :  { %v2465_v16 = vpop.eup %2464 }
 0xa8a   :  { %v1695_v17 = vmul.f32 %v2465_v16, %v2457_v63 }
 0xa8c   :  { %2332 = vmatmul.msk.f32.vlgmr.msrb.gmra.mxu0 %vm734_vm0, %v1695_v17 }
 0xa8d   :  { %1993 = vmatpush.msrb.mxu0 %v2354_v3  ;;  %v2417_v3 = vld [vmem:[%s3539_s21 + $0x1] ss:$0 sm:$0xff]  ;;  %s2202_s21 = sshll.u32 %s3546_s28, 4  ;;  %s2203_s21 = int_to_ptr.hbm [resolvable:$true] %s2202_s21 }
 0xa8f   :  { %1994 = vmatpush.msrb.mxu0 %v2353_v4 }
 0xa91   :  { %1995 = vmatpush.msrb.mxu0 %v2352_v5 }
 0xa93   :  { %1996 = vmatpush.msrb.mxu0 %v2351_v0 }
 0xa9b   :  { %v1684_v19 = vpop.xlane.xlu2 %1683 }
 0xa9c   :  { %2466 = vrcp.f32 %v1684_v19  ;;  %v1687_v57 = vpop.xlane.xlu0 %1686 }
 0xa9d   :  { %2468 = vrcp.f32 %v1687_v57 }
 0xaa2   :  { %v2467_v20 = vpop.eup %2466 }
 0xaa3   :  { %v2469_v21 = vpop.eup %2468  ;;  %v1696_v47 = vmul.f32 %v2467_v20, %v2459_v8  ;;  %v1690_v22 = vpop.xlane.xlu2 %1689 }
 0xaa4   :  { %v1697_v23 = vmul.f32 %v2469_v21, %v2461_v10  ;;  %2470 = vrcp.f32 %v1690_v22  ;;  %v2414_v22 = vld [vmem:[%s3534_s16 + $0x1] ss:$0 sm:$0xff] }
 0xaa5   :  { %2333 = vmatmul.msk.f32.vlgmr.msra.gmra.mxu2 %vm734_vm0, %v1696_v47 }
 0xaa6   :  { %2334 = vmatmul.msk.f32.vlgmr.msra.gmra.mxu3 %vm734_vm0, %v1697_v23  ;;  %2050 = vmatpush.msra.mxu2 %v2365_v33 }
 0xaaa   :  { %v2471_v24 = vpop.eup %2470 }
 0xaab   :  { %v1698_v25 = vmul.f32 %v2471_v24, %v2463_v13 }
 0xaad   :  { %2335 = vmatmul.msk.f32.vlgmr.msrb.gmra.mxu1 %vm734_vm0, %v1698_v25 }
 0xb09   :  { %v1719_v32 = vpop.f32.mrf.mxu0 }
 0xb0a   :  { %2344 = vmatmul.msk.f32.vlgmr.msra.gmra.mxu0 %vm621_vm15, %v1719_v32 }
 0xb28   :  { %v1742_v34 = vpop.f32.mrf.mxu2 }
 0xb29   :  { %v1765_v37 = vpop.f32.mrf.mxu3  ;;  %2345 = vmatmul.msk.f32.vlgmr.msrb.gmra.mxu2 %vm621_vm15, %v1742_v34  ;;  %v2364_v34 = vld [vmem:[%s3538_s20 + $0x70] sm:$0xff] }
 0xb2a   :  { %2346 = vmatmul.msk.f32.vlgmr.msrb.gmra.mxu3 %vm621_vm15, %v1765_v37  ;;  %v1788_v38 = vpop.f32.mrf.mxu1  ;;  %2051 = vmatpush.msra.mxu2 %v2364_v34  ;;  %v2363_v37 = vld [vmem:[%s3538_s20 + $0x68] sm:$0xff] }
 0xb2b   :  { %2347 = vmatmul.msk.f32.vlgmr.msra.gmra.mxu1 %vm621_vm15, %v1788_v38  ;;  %v2362_v38 = vld [vmem:[%s3538_s20 + $0x60] sm:$0xff] }
 0xb2c   :  { %2052 = vmatpush.msra.mxu2 %v2363_v37 }
 0xb2e   :  { %2053 = vmatpush.msra.mxu2 %v2362_v38 }
 0xb87   :  { %v1820_v39 = vpop.f32.mrf.mxu0 }
 0xb88   :  { %v1892_v43 = vsel %vm213_vm7, %v1820_v39, 0.0  ;;  %v2361_v39 = vld [vmem:[%s3538_s20 + $0x58] sm:$0xff] }
 0xb89   :  { %2054 = vmatpush.msra.mxu2 %v2361_v39 }
 0xba8   :  { %v1889_v36 = vpop.f32.mrf.mxu1 }
 0xba9   :  { %v1896_v46 = vsel %vm213_vm7, %v1889_v36, 0.0  ;;  %v2360_v36 = vld [vmem:[%s3538_s20 + $0x50] sm:$0xff] }
 0xbaa   :  { %2055 = vmatpush.msra.mxu2 %v2360_v36 }
 0xbac   :  { %v1843_v40 = vpop.f32.mrf.mxu2 }
 0xbad   :  { %v1893_v44 = vsel %vm213_vm7, %v1843_v40, 0.0  ;;  %v1866_v45 = vpop.f32.mrf.mxu3  ;;  %v2359_v40 = vld [vmem:[%s3538_s20 + $0x48] sm:$0xff] }
 0xbae   :  { %v1894_v48 = vadd.f32 %v1893_v44, %v1892_v43  ;;  %v1895_v49 = vsel %vm213_vm7, %v1866_v45, 0.0  ;;  %2056 = vmatpush.msra.mxu2 %v2359_v40  ;;  %v2416_v43 = vld [vmem:[%s3537_s19 + $0x1] ss:$0 sm:$0xff]  ;;  %s2200_s19 = sshll.u32 %s2515_s18, 4  ;;  %s2201_s19 = int_to_ptr.vmem [resolvable:$true] %s2200_s19 }
 0xbaf   :  { %v1897_v41 = vadd.f32 %v1896_v46, %v1895_v49 }
 0xbb0   :  { %v1903_v51 = vadd.f32 %v2413_v42, %v1894_v48 }
 0xbb1   :  { %v1904_v53 = vadd.f32 %v2413_v42, %v1897_v41  ;;  %v2358_v42 = vld [vmem:[%s3538_s20 + $0x40] sm:$0xff] }
 0xbb2   :  { %v1905_v55 = vadd.f32 %v1903_v51, %v3223_v35  ;;  %2057 = vmatpush.msra.mxu2 %v2358_v42 }
 0xbb3   :  { %v1906_v56 = vadd.f32 %v1904_v53, %v3261_v50 }
 0xbb4   :  { %v1911_v60 = vsel %vm213_vm7, %v1905_v55, 0.0 }
 0xbb5   :  { %1912 = vadd.xlane.f32.xlu0 %v1911_v60  ;;  %v1914_v58 = vsel %vm213_vm7, %v1906_v56, 0.0 }
 0xbb6   :  { %1915 = vadd.xlane.f32.xlu1 %v1914_v58 }
 0xc28   :  { %v1913_v59 = vpop.xlane.xlu0 %1912 }
 0xc29   :  { %v1916_v61 = vpop.xlane.xlu1 %1915  ;;  %v1917_v62 = vmul.f32 %v1913_v59, %v2743_v54 }
 0xc2a   :  { %v1918_v63 = vmul.f32 %v1916_v61, %v2743_v54 }
 0xc2b   :  { %v1919_v6 = vsub.f32 %v1905_v55, %v1917_v62 }
 0xc2c   :  { %v1920_v52 = vsub.f32 %v1906_v56, %v1918_v63 }
 0xc2d   :  { %v1921_v1 = vmul.f32 %v1919_v6, %v1919_v6 }
 0xc2e   :  { %v1922_v2 = vmul.f32 %v1920_v52, %v1920_v52 }
 0xc2f   :  { %v1923_v35 = vsel %vm213_vm7, %v1921_v1, 0.0 }
 0xc30   :  { %v1926_v50 = vsel %vm213_vm7, %v1922_v2, 0.0  ;;  %1924 = vadd.xlane.f32.xlu2 %v1923_v35 }
 0xc31   :  { %1927 = vadd.xlane.f32.xlu0 %v1926_v50 }
 0xca3   :  { %v1925_v7 = vpop.xlane.xlu2 %1924 }
 0xca4   :  { %v1929_v8 = vmul.f32 %v1925_v7, %v2743_v54  ;;  %v1928_v9 = vpop.xlane.xlu0 %1927 }
 0xca5   :  { %v1930_v10 = vmul.f32 %v1928_v9, %v2743_v54 }
 0xca6   :  { %v1931_v11 = vadd.f32 1e-05, %v1929_v8 }
 0xca7   :  { %v1932_v12 = vadd.f32 1e-05, %v1930_v10 }
 0xca8   :  { %2472 = vrsqrt.f32 %v1931_v11  ;;  %vm1939_vm0 = vweird.f32 %v1931_v11 }
 0xca9   :  { %2474 = vrsqrt.f32 %v1932_v12  ;;  %vm1949_vm3 = vweird.f32 %v1932_v12 }
 0xcae   :  { %v2473_v13 = vpop.eup %2472 }
 0xcaf   :  { %v2475_v14 = vpop.eup %2474  ;;  %v1934_v15 = vmul.f32 %v2473_v13, %v1931_v11  ;;  %vm1940_vm15 = vweird.f32 %v2473_v13 }
 0xcb0   :  { %v1944_v16 = vmul.f32 %v2475_v14, %v1932_v12  ;;  %vm1950_vm1 = vweird.f32 %v2475_v14  ;;  %vm1941_vm2 = vmor %vm1939_vm0, %vm1940_vm15 }
 0xcb1   :  { %v1935_v17 = vmul.f32 %v2473_v13, %v1934_v15  ;;  %vm1951_vm5 = vmor %vm1949_vm3, %vm1950_vm1 }
 0xcb2   :  { %v1945_v18 = vmul.f32 %v2475_v14, %v1944_v16 }
 0xcb3   :  { %v1936_v19 = vmul.f32 0.5, %v1935_v17 }
 0xcb4   :  { %v1946_v57 = vmul.f32 0.5, %v1945_v18 }
 0xcb5   :  { %v1937_v20 = vsub.f32 1.5, %v1936_v19 }
 0xcb6   :  { %v1947_v21 = vsub.f32 1.5, %v1946_v57 }
 0xcb7   :  { %v1938_v47 = vmul.f32 %v2473_v13, %v1937_v20 }
 0xcb8   :  { %v1948_v23 = vmul.f32 %v2475_v14, %v1947_v21 }
 0xcb9   :  { %v1942_v24 = vsel %vm1941_vm2, %v2473_v13, %v1938_v47 }
 0xcba   :  { %v1953_v25 = vmul.f32 %v1942_v24, %v1919_v6  ;;  %v1952_v27 = vsel %vm1951_vm5, %v2475_v14, %v1948_v23  ;;  %v2132_v23 = vld [vmem:[%s3542_s24 + $0x10] sm:$0xff] }
 0xcbb   :  { %v1954_v30 = vmul.f32 %v1952_v27, %v1920_v52 }
 0xcbc   :  { %v1958_v28 = vmul.f32 %v2414_v22, %v1953_v25  ;;  %v2131_v25 = vld [vmem:[%s3542_s24 + $0x8] sm:$0xff] }
 0xcbd   :  { %v1959_v31 = vmul.f32 %v2414_v22, %v1954_v30  ;;  %v2133_v22 = vld [vmem:[%s3542_s24 + $0x18] sm:$0xff] }
 0xcbe   :  { %v1963_v29 = vadd.f32 %v2415_v26, %v1958_v28  ;;  %2153 = vmatpush.msra.mxu3 %v2133_v22 }
 0xcbf   :  { %v1964_v32 = vadd.f32 %v2415_v26, %v1959_v31  ;;  %v2130_v26 = vld [vmem:[%s3542_s24] sm:$0xff] }
 0xcc0   :  { %2356 = vmatmul.msk.f32.vlgmr.msrb.gmra.mxu0 %vm213_vm7, %v1963_v29  ;;  %2154 = vmatpush.msra.mxu3 %v2132_v23 }
 0xcc2   :  { %2155 = vmatpush.msra.mxu3 %v2131_v25 }
 0xcc4   :  { %2156 = vmatpush.msra.mxu3 %v2130_v26 }
 0xcc8   :  { %2357 = vmatmul.msk.f32.gmra.mxu0 %vm213_vm7, %v1964_v32 }
 0xd3d   :  { %v1998_v44 = vpop.f32.mrf.mxu0 }
 0xd3e   :  { %v1999_v45 = vadd.f32 %v2416_v43, %v1998_v44 }
 0xd40   :  { %v2006_v46 = vmul.f32 0.044715, %v1999_v45  ;;  %v2004_v63 = vmul.f32 0.5, %v1999_v45 }
 0xd42   :  { %v2008_v48 = vmul.f32 %v2006_v46, %v1999_v45 }
 0xd44   :  { %v2010_v49 = vmul.f32 %v2008_v48, %v1999_v45 }
 0xd45   :  { %v2001_v41 = vpop.f32.mrf.mxu0 }
 0xd46   :  { %v2012_v51 = vadd.f32 %v2010_v49, %v1999_v45  ;;  %v2002_v53 = vadd.f32 %v2416_v43, %v2001_v41 }
 0xd48   :  { %v2014_v55 = vmul.f32 0.7978846, %v2012_v51  ;;  %v2007_v56 = vmul.f32 0.044715, %v2002_v53  ;;  %v2005_v2 = vmul.f32 0.5, %v2002_v53 }
 0xd49   :  { %v2419_v51 = vld [vmem:[%s3541_s23 + $0x1] ss:$0 sm:$0xff] }
 0xd4a   :  { %2476 = vtanh.f32 %v2014_v55  ;;  %v2009_v60 = vmul.f32 %v2007_v56, %v2002_v53 }
 0xd4c   :  { %v2011_v58 = vmul.f32 %v2009_v60, %v2002_v53 }
 0xd4e   :  { %v2013_v59 = vadd.f32 %v2011_v58, %v2002_v53  ;;  %v2165_v58 = vld [vmem:[%s3544_s26 + $0x18] sm:$0xff] }
 0xd4f   :  { %2185 = vmatpush.msrb.mxu1 %v2165_v58 }
 0xd50   :  { %v2477_v61 = vpop.eup %2476  ;;  %v2015_v62 = vmul.f32 0.7978846, %v2013_v59  ;;  %v2164_v59 = vld [vmem:[%s3544_s26 + $0x10] sm:$0xff] }
 0xd51   :  { %v2018_v6 = vadd.f32 1.0, %v2477_v61  ;;  %v2163_v61 = vld [vmem:[%s3544_s26 + $0x8] sm:$0xff]  ;;  %2186 = vmatpush.msrb.mxu1 %v2164_v59 }
 0xd52   :  { %2478 = vtanh.f32 %v2015_v62  ;;  %v2162_v62 = vld [vmem:[%s3544_s26] sm:$0xff] }
 0xd53   :  { %v2020_v52 = vmul.f32 %v2018_v6, %v2004_v63  ;;  %2187 = vmatpush.msrb.mxu1 %v2163_v61  ;;  %v2420_v63 = vld [vmem:[%s3543_s25] ss:$0 sm:$0xff] }
 0xd55   :  { %2367 = vmatmul.msk.f32.vlgmr.msra.gmra.mxu2 %vm141_vm4, %v2020_v52  ;;  %2188 = vmatpush.msrb.mxu1 %v2162_v62 }
 0xd58   :  { %v2479_v1 = vpop.eup %2478 }
 0xd59   :  { %v2019_v35 = vadd.f32 1.0, %v2479_v1 }
 0xd5b   :  { %v2021_v50 = vmul.f32 %v2019_v35, %v2005_v2  ;;  %v2421_v2 = vld [vmem:[%s3545_s27] ss:$0 sm:$0xff] }
 0xd5d   :  { %2368 = vmatmul.msk.f32.gmra.mxu2 %vm141_vm4, %v2021_v50 }
 0xdd8   :  { %v2059_v4 = vpop.f32.mrf.mxu2 }
 0xdd9   :  { %v2060_v5 = vadd.f32 %v2417_v3, %v2059_v4 }
 0xddb   :  { %v2065_v0 = vadd.f32 %v2060_v5, %v1963_v29 }
 0xddd   :  { %v2071_v7 = vsel %vm213_vm7, %v2065_v0, 0.0 }
 0xdde   :  { %2072 = vadd.xlane.f32.xlu2 %v2071_v7 }
 0xde0   :  { %v2062_v8 = vpop.f32.mrf.mxu2 }
 0xde1   :  { %v2063_v9 = vadd.f32 %v2417_v3, %v2062_v8 }
 0xde3   :  { %v2066_v10 = vadd.f32 %v2063_v9, %v1964_v32 }
 0xde5   :  { %v2074_v11 = vsel %vm213_vm7, %v2066_v10, 0.0 }
 0xde6   :  { %2075 = vadd.xlane.f32.xlu1 %v2074_v11 }
 0xe51   :  { %v2073_v12 = vpop.xlane.xlu2 %2072 }
 0xe52   :  { %v2077_v13 = vmul.f32 %v2073_v12, %v2743_v54 }
 0xe54   :  { %v2079_v14 = vsub.f32 %v2065_v0, %v2077_v13 }
 0xe56   :  { %v2081_v15 = vmul.f32 %v2079_v14, %v2079_v14 }
 0xe58   :  { %v2083_v16 = vsel %vm213_vm7, %v2081_v15, 0.0 }
 0xe59   :  { %2084 = vadd.xlane.f32.xlu1 %v2083_v16  ;;  %v2076_v17 = vpop.xlane.xlu1 %2075 }
 0xe5a   :  { %v2078_v18 = vmul.f32 %v2076_v17, %v2743_v54 }
 0xe5c   :  { %v2080_v19 = vsub.f32 %v2066_v10, %v2078_v18 }
 0xe5e   :  { %v2082_v57 = vmul.f32 %v2080_v19, %v2080_v19 }
 0xe60   :  { %v2086_v20 = vsel %vm213_vm7, %v2082_v57, 0.0 }
 0xe61   :  { %2087 = vadd.xlane.f32.xlu0 %v2086_v20 }
 0xecc   :  { %v2085_v21 = vpop.xlane.xlu1 %2084 }
 0xecd   :  { %v2089_v47 = vmul.f32 %v2085_v21, %v2743_v54 }
 0xecf   :  { %v2091_v24 = vadd.f32 1e-05, %v2089_v47 }
 0xed1   :  { %2480 = vrsqrt.f32 %v2091_v24  ;;  %vm2099_vm6 = vweird.f32 %v2091_v24 }
 0xed4   :  { %v2088_v27 = vpop.xlane.xlu0 %2087 }
 0xed5   :  { %v2090_v28 = vmul.f32 %v2088_v27, %v2743_v54  ;;  %v2418_v54 = vld [vmem:[%s3540_s22 + $0x1] ss:$0 sm:$0xff] }
 0xed7   :  { %v2481_v29 = vpop.eup %2480  ;;  %v2092_v30 = vadd.f32 1e-05, %v2090_v28 }
 0xed8   :  { %v2094_v31 = vmul.f32 %v2481_v29, %v2091_v24  ;;  %vm2100_vm4 = vweird.f32 %v2481_v29 }
 0xed9   :  { %2482 = vrsqrt.f32 %v2092_v30  ;;  %vm2101_vm8 = vmor %vm2099_vm6, %vm2100_vm4  ;;  %vm2109_vm10 = vweird.f32 %v2092_v30 }
 0xeda   :  { %v2095_v32 = vmul.f32 %v2481_v29, %v2094_v31 }
 0xedc   :  { %v2096_v33 = vmul.f32 0.5, %v2095_v32 }
 0xede   :  { %v2097_v34 = vsub.f32 1.5, %v2096_v33 }
 0xedf   :  { %v2483_v37 = vpop.eup %2482 }
 0xee0   :  { %v2104_v38 = vmul.f32 %v2483_v37, %v2092_v30  ;;  %v2098_v39 = vmul.f32 %v2481_v29, %v2097_v34  ;;  %vm2110_vm9 = vweird.f32 %v2483_v37 }
 0xee1   :  { %vm2111_vm11 = vmor %vm2109_vm10, %vm2110_vm9 }
 0xee2   :  { %v2105_v36 = vmul.f32 %v2483_v37, %v2104_v38  ;;  %v2102_v42 = vsel %vm2101_vm8, %v2481_v29, %v2098_v39 }
 0xee3   :  { %v2113_v45 = vmul.f32 %v2102_v42, %v2079_v14 }
 0xee4   :  { %v2106_v40 = vmul.f32 0.5, %v2105_v36 }
 0xee5   :  { %v2118_v49 = vmul.f32 %v2418_v54, %v2113_v45 }
 0xee6   :  { %v2107_v43 = vsub.f32 1.5, %v2106_v40 }
 0xee7   :  { %v2123_v55 = vadd.f32 %v2419_v51, %v2118_v49 }
 0xee8   :  { %v2108_v44 = vmul.f32 %v2483_v37, %v2107_v43 }
 0xeea   :  { %v2112_v46 = vsel %vm2111_vm11, %v2483_v37, %v2108_v44 }
 0xeeb   :  { %v2114_v48 = vmul.f32 %v2112_v46, %v2080_v19 }
 0xeed   :  { %v2119_v41 = vmul.f32 %v2418_v54, %v2114_v48 }
 0xeef   :  { %v2124_v53 = vadd.f32 %v2419_v51, %v2119_v41 }
 0xef1   :  { %v2126_v56 = vrot.slane %v2124_v53, 7 }
 0xef3   :  { %v2129_v60 = vsel %vm2128_vm12, %v2123_v55, %v2126_v56 }
 0xef4   :  { %2371 = vmatmul.msk.f32.vlgmr.msra.gmra.mxu3 %vm213_vm7, %v2129_v60 }
 0xf77   :  { %v2158_v6 = vpop.f32.mrf.mxu3 }
 0xf78   :  { %v2159_v52 = vadd.f32 %v2420_v63, %v2158_v6 }
 0xf7a   :  { %2484 = vtanh.f32 %v2159_v52 }
 0xf80   :  { %v2485_v1 = vpop.eup %2484 }
 0xf81   :  { %2372 = vmatmul.msk.f32.vlgmr.msrb.gmra.mxu1 %vm213_vm7, %v2485_v1 }
 0xffe   :  { %v2190_v35 = vpop.f32.mrf.mxu1 }
 0xfff   :  { %v2191_v50 = vadd.f32 %v2421_v2, %v2190_v35 }
0x1001   :  { %2194 = vst.msk [vmem:[#allocation2] sm:$0x3] %vm2193_vm13, %v2191_v50 }
0x1002   :  { %2205 = dma.vmem_to_hbm [thread:$0]  %s2201_s19, 32, %s2203_s21, [#allocation3]  }
0x1003   :  { %2510 = dma.done.wait [#allocation3], 32  }
0x1004   :  { %2511 = vsyncadd [#allocation3], 4294967264 }
0x1005   :  { %2210 = vsyncpa [#allocation3], 1 }

</bundles_post_ra>
